<compile_context>
chip_gen: v6e
topology: v6e:2x2x1
jax: 0.10.0
libtpu: 0.0.40
codegen_flags: <defaults>
</compile_context>

<pallas_src>
import functools

import jax
import jax.numpy as jnp
from jax import lax
from jax.experimental import pallas as pl
from jax.experimental.pallas import tpu as pltpu

STOP_IX = 0      # stop_logps[..., STOP_IX]     -> "beta"
CONTINUE_IX = 1  # stop_logps[..., CONTINUE_IX] -> "1 - beta"

ABSTRACT_PEN = 0.5

# Working sets here are << 1 MiB; 32 MiB is comfortably inside v7x's 64 MiB
# physical VMEM and the v5e/v6e scoped defaults (re-derive if blocks grow).
VMEM_LIMIT_BYTES = 32 * 1024 * 1024


def _round_up(x, m):
    return ((x + m - 1) // m) * m


# ----------------------------------------------------------------------------
# Kernel A: fused control-net MLP, transposed (batch on lanes), lane-dense out
# ----------------------------------------------------------------------------
def control_net_kernel(x_ref, oh_ref, w1_ref, b1_ref, wh_ref, bh_ref, sel_ref,
                       out_ref, *, nb, na, abstract_pen):
    # x_ref  : (S, Bp)     f32  states for one time slice (columns = batch)
    # oh_ref : (A, Bp)     f32  chosen-action one-hot tiled per option group
    # w1_ref : (H, S)      bf16 trunk weight (pre-transposed/cast)
    # b1_ref : (H, 1)      f32
    # wh_ref : (OUT, H)    bf16 fused head weight, OUT = nb*na + 3*nb
    # bh_ref : (OUT, 1)    f32
    # sel_ref: (nb, A)     f32  block-diagonal group-sum selector (ones)
    # out_ref: (4*nb, Bp)  f32  rows = [chosen | beta | cont | start]
    A = nb * na

    # trunk + fused heads: two MXU matmuls, bf16 in / f32 accumulate
    h = jnp.tanh(jnp.dot(w1_ref[...], x_ref[...].astype(jnp.bfloat16),
                         preferred_element_type=jnp.float32) + b1_ref[...])
    logits = (jnp.dot(wh_ref[...], h.astype(jnp.bfloat16),
                      preferred_element_type=jnp.float32) + bh_ref[...])

    act_l = logits[:A, :]                                          # (A, Bp)
    sel = sel_ref[...]                                             # (nb, A)

    # chosen-action gather + per-option log-sum-exp on the MXU:
    #   chosen_j = <act_l[j*na:(j+1)*na, :], onehot> - logsumexp_a(...)
    # NOTE: a single per-column max is shared across option groups; fine for
    # learned log-softmax logits (validated against the pure-JAX reference).
    chosen_logit = jnp.dot(sel, act_l * oh_ref[...],
                           preferred_element_type=jnp.float32)     # (nb, Bp)
    m = jnp.max(act_l, axis=0, keepdims=True)                      # (1, Bp)
    gsum = jnp.dot(sel, jnp.exp(act_l - m),
                   preferred_element_type=jnp.float32)             # (nb, Bp)
    chosen = chosen_logit - (m + jnp.log(gsum))

    beta_l = logits[A:A + nb, :]
    cont_l = logits[A + nb:A + 2 * nb, :]
    start_l = logits[A + 2 * nb:A + 3 * nb, :]

    # stop head: 2-way log-softmax via single-exp logaddexp
    hi = jnp.maximum(beta_l, cont_l)
    lo = jnp.minimum(beta_l, cont_l)
    z = hi + jnp.log(1.0 + jnp.exp(lo - hi))

    # start head: log-softmax over options; abstract_pen applied post-softmax
    # in-kernel (cannot be folded into the pre-softmax bias).
    ms = jnp.max(start_l, axis=0, keepdims=True)
    start = start_l - (ms + jnp.log(jnp.sum(jnp.exp(start_l - ms), axis=0,
                                            keepdims=True))) - abstract_pen

    # lane-dense direct slice stores (Bp is a multiple of 128 -> unmasked vst)
    out_ref[0 * nb:1 * nb, :] = chosen
    out_ref[1 * nb:2 * nb, :] = beta_l - z
    out_ref[2 * nb:3 * nb, :] = cont_l - z
    out_ref[3 * nb:4 * nb, :] = start


def control_net_apply(x_t, oh_t, params, *, bp, abstract_pen):
    """x_t: (S, Tp1*Bp), oh_t: (A, Tp1*Bp). Returns heads (Tp1, 4*nb, Bp)."""
    S, Np = x_t.shape
    Tp1 = Np // bp
    H = params["w1"].shape[1]
    nb, _, na = params["wa"].shape
    A = nb * na
    OUT = A + 3 * nb

    # fused head weights along the output dim: [action | beta | cont | start],
    # pre-transposed and pre-cast to bf16 (halves weight DMA bytes / buffers).
    wa_flat = jnp.transpose(params["wa"], (1, 0, 2)).reshape(H, A)
    w_heads = jnp.concatenate(
        [wa_flat, params["wb"], params["wc"], params["wst"]], axis=1)   # (H,OUT)
    b_heads = jnp.concatenate(
        [params["ba"].reshape(A), params["bb"].reshape(nb),
         params["bc"].reshape(nb), params["bst"].reshape(nb)])          # (OUT,)
    w1_t = params["w1"].T.astype(jnp.bfloat16)                          # (H, S)
    wh_t = w_heads.T.astype(jnp.bfloat16)                               # (OUT,H)
    b1_t = params["b1"].reshape(H, 1).astype(jnp.float32)
    bh_t = b_heads.reshape(OUT, 1).astype(jnp.float32)
    # block-diagonal group selector: sel[j, k] = 1 iff k // na == j
    sel = (jnp.arange(A, dtype=jnp.int32)[None, :] // na
           == jnp.arange(nb, dtype=jnp.int32)[:, None]).astype(jnp.float32)

    kernel = functools.partial(control_net_kernel, nb=nb, na=na,
                               abstract_pen=abstract_pen)
    flops = 2 * Np * (S * H + H * OUT + 2 * A * nb)
    transcendentals = Np * (H + A + 3 * nb)
    bytes_accessed = 4 * Np * (S + A + 4 * nb) + 2 * (S * H + H * OUT)

    return pl.pallas_call(
        kernel,
        out_shape=jax.ShapeDtypeStruct((Tp1, 4 * nb, bp), jnp.float32),
        grid_spec=pltpu.PrefetchScalarGridSpec(
            num_scalar_prefetch=0,
            grid=(Tp1,),
            in_specs=[
                pl.BlockSpec((S, bp), lambda i: (0, i)),
                pl.BlockSpec((A, bp), lambda i: (0, i)),
                # constant-index weight blocks stay resident across the grid
                pl.BlockSpec((H, S), lambda i: (0, 0)),
                pl.BlockSpec((H, 1), lambda i: (0, 0)),
                pl.BlockSpec((OUT, H), lambda i: (0, 0)),
                pl.BlockSpec((OUT, 1), lambda i: (0, 0)),
                pl.BlockSpec((nb, A), lambda i: (0, 0)),
            ],
            out_specs=pl.BlockSpec((None, 4 * nb, bp), lambda i: (i, 0, 0)),
        ),
        compiler_params=pltpu.CompilerParams(
            dimension_semantics=("parallel",),
            vmem_limit_bytes=VMEM_LIMIT_BYTES),
        cost_estimate=pl.CostEstimate(flops=flops,
                                      transcendentals=transcendentals,
                                      bytes_accessed=bytes_accessed),
    )(x_t, oh_t, w1_t, b1_t, wh_t, bh_t, sel)


# ----------------------------------------------------------------------------
# Kernel B: hmm_fw recursion, fused heads input, batch-parallel, time-chunked
# ----------------------------------------------------------------------------
def hmm_fw_kernel(len_ref, heads_ref, out_ref, f_sc, x0_sc, x1_sc, *, nb, max_T):
    # len_ref  : (1, 128)            int32 trajectory lengths (padded cols = 1)
    # heads_ref: (t_chunk, 4*nb, 128) f32  rows [chosen|beta|cont|start] per step
    # out_ref  : (1, 128)            f32  total log-prob per trajectory
    # f/x0/x1  : (nb, 128)           f32  VMEM scratch carried across chunks
    c = pl.program_id(1)
    t_chunk = heads_ref.shape[0]
    bb = f_sc.shape[1]
    lengths = len_ref[...]                                    # (1, bb)
    neg_inf = jnp.float32(-jnp.inf)

    @pl.when(c == 0)
    def _():
        # i = 0:  f[0] = start_logps[:, 0] + action_logps[:, 0]
        blk0 = heads_ref[0]                                   # (4*nb, bb)
        f0 = blk0[3 * nb:4 * nb, :] + blk0[0:nb, :]
        f_sc[...] = f0
        x0_sc[...] = jnp.where(lengths == 1, f0, jnp.full((nb, bb), neg_inf))
        x1_sc[...] = jnp.full((nb, bb), neg_inf)

    base = c * t_chunk

    def step(j, carry):
        f, x0, x1 = carry
        i = base + j                                          # global time idx
        blk = heads_ref[j]                                    # (4*nb, bb)
        act_i = blk[0:nb, :]
        beta_i = blk[nb:2 * nb, :]
        cont_i = blk[2 * nb:3 * nb, :]
        start_i = blk[3 * nb:4 * nb, :]

        # x1 = stop_logps[range(B), lengths, :, STOP_IX], folded into this pass
        x1 = jnp.where((i >= 1) & (i <= max_T) & (lengths == i), beta_i, x1)

        # recursion (valid for 1 <= i <= max_T - 1):
        #   f = logaddexp(f + (1-beta), logsumexp_b(f + beta) + start) + act
        s = f + beta_i
        m = jnp.max(s, axis=0, keepdims=True)                 # sublane reduce
        inner = m + jnp.log(jnp.sum(jnp.exp(s - m), axis=0, keepdims=True))
        a = f + cont_i
        b_ = inner + start_i
        hi = jnp.maximum(a, b_)
        lo = jnp.minimum(a, b_)
        f_new = hi + jnp.log(1.0 + jnp.exp(lo - hi)) + act_i  # single exp/log

        do_rec = (i >= 1) & (i <= max_T - 1)
        f = jnp.where(do_rec, f_new, f)
        x0 = jnp.where(do_rec & (lengths == i + 1), f_new, x0)
        return f, x0, x1

    f, x0, x1 = lax.fori_loop(0, t_chunk, step,
                              (f_sc[...], x0_sc[...], x1_sc[...]),
                              unroll=True)
    f_sc[...] = f
    x0_sc[...] = x0
    x1_sc[...] = x1

    @pl.when(c == pl.num_programs(1) - 1)
    def _():
        s = x0_sc[...] + x1_sc[...]
        m = jnp.max(s, axis=0, keepdims=True)
        out_ref[...] = m + jnp.log(jnp.sum(jnp.exp(s - m), axis=0, keepdims=True))


def hmm_fw_pallas(heads, lengths_p, *, max_T, t_chunk=32):
    """heads: (Tp1, 4*nb, Bp) from kernel A; lengths_p: (Bp,) int32 (padded=1).

    Returns (Bp,) total log-probs (padded columns are garbage-but-finite)."""
    Tp1, four_nb, Bp = heads.shape
    nb = four_nb // 4
    t_chunk = max(1, min(t_chunk, Tp1))
    T_pad = _round_up(Tp1, t_chunk)
    num_chunks = T_pad // t_chunk
    n_bblk = Bp // 128

    heads_p = jnp.pad(heads, ((0, T_pad - Tp1), (0, 0), (0, 0)))
    len_p = lengths_p.reshape(1, Bp)

    kernel = functools.partial(hmm_fw_kernel, nb=nb, max_T=max_T)
    flops = 16 * T_pad * nb * Bp
    transcendentals = 3 * T_pad * nb * Bp
    bytes_accessed = 4 * (T_pad * four_nb * Bp + 2 * Bp)

    out = pl.pallas_call(
        kernel,
        out_shape=jax.ShapeDtypeStruct((1, Bp), jnp.float32),
        grid_spec=pltpu.PrefetchScalarGridSpec(
            num_scalar_prefetch=0,
            grid=(n_bblk, num_chunks),
            in_specs=[
                pl.BlockSpec((1, 128), lambda b, c: (0, b)),
                pl.BlockSpec((t_chunk, four_nb, 128), lambda b, c: (c, 0, b)),
            ],
            out_specs=pl.BlockSpec((1, 128), lambda b, c: (0, b)),
            scratch_shapes=[pltpu.VMEM((nb, 128), jnp.float32)] * 3,
        ),
        compiler_params=pltpu.CompilerParams(
            dimension_semantics=("parallel", "arbitrary"),
            vmem_limit_bytes=VMEM_LIMIT_BYTES),
        cost_estimate=pl.CostEstimate(flops=flops,
                                      transcendentals=transcendentals,
                                      bytes_accessed=bytes_accessed),
    )(len_p, heads_p)
    return out[0]


# ----------------------------------------------------------------------------
# HmmNet.forward equivalent (glue: one transpose of the state tensor, padding)
# ----------------------------------------------------------------------------
def hmm_net_forward(params, s_i_batch, actions_batch, lengths,
                    abstract_pen=ABSTRACT_PEN, t_chunk=32):
    B, Tp1, S = s_i_batch.shape
    max_T = Tp1 - 1
    nb, _, na = params["wa"].shape
    A = nb * na
    Bp = _round_up(B, 128)
    Np = Tp1 * Bp

    # batch-on-lanes layout built once; no per-head transposes downstream.
    # states: (B, T+1, S) -> (S, T+1, B) -> pad batch -> (S, Np)
    x_t = jnp.transpose(s_i_batch.astype(jnp.float32), (2, 1, 0))
    x_t = jnp.pad(x_t, ((0, 0), (0, 0), (0, Bp - B))).reshape(S, Np)

    # chosen-action one-hot tiled per option group: (A, Np). The t == max_T row
    # gets a dummy action 0; its chosen log-prob is never consumed downstream.
    acts = jnp.concatenate(
        [actions_batch.astype(jnp.int32), jnp.zeros((B, 1), jnp.int32)], axis=1)
    acts_t = jnp.pad(acts.T, ((0, 0), (0, Bp - B)))                 # (Tp1, Bp)
    oh = (jnp.arange(na, dtype=jnp.int32)[:, None, None]
          == acts_t[None]).astype(jnp.float32)                      # (na,Tp1,Bp)
    oh_t = jnp.tile(oh.reshape(na, Np), (nb, 1))                    # (A, Np)

    heads = control_net_apply(x_t, oh_t, params, bp=Bp,
                              abstract_pen=abstract_pen)            # (Tp1,4nb,Bp)

    len_p = jnp.pad(lengths.astype(jnp.int32), (0, Bp - B), constant_values=1)
    total = hmm_fw_pallas(heads, len_p, max_T=max_T, t_chunk=t_chunk)  # (Bp,)

    # solved == 'None' for the synthetic control net -> solved_loss = 0
    return -jnp.sum(total[:B])


# ----------------------------------------------------------------------------
# Pure-JAX reference (direct port of hmm_fw / logp_loss) for a sanity check
# ----------------------------------------------------------------------------
def reference_forward(params, s_i_batch, actions_batch, lengths,
                      abstract_pen=ABSTRACT_PEN):
    from jax.scipy.special import logsumexp
    bf = jnp.bfloat16
    B, Tp1, S = s_i_batch.shape
    max_T = Tp1 - 1
    x = s_i_batch.reshape(B * Tp1, S).astype(jnp.float32)

    h = jnp.tanh(jnp.dot(x.astype(bf), params["w1"].astype(bf),
                         preferred_element_type=jnp.float32) + params["b1"])
    hb = h.astype(bf)
    act_logits = (jnp.einsum("nh,bha->nba", hb, params["wa"].astype(bf),
                             preferred_element_type=jnp.float32)
                  + jnp.transpose(params["ba"], (1, 0, 2)))
    act_logps = jax.nn.log_softmax(act_logits, axis=-1)             # (N, nb, na)

    beta_l = jnp.dot(hb, params["wb"].astype(bf),
                     preferred_element_type=jnp.float32) + params["bb"]
    cont_l = jnp.dot(hb, params["wc"].astype(bf),
                     preferred_element_type=jnp.float32) + params["bc"]
    z = jnp.logaddexp(beta_l, cont_l)
    beta = (beta_l - z).reshape(B, Tp1, -1)
    cont = (cont_l - z).reshape(B, Tp1, -1)
    start_l = jnp.dot(hb, params["wst"].astype(bf),
                      preferred_element_type=jnp.float32) + params["bst"]
    start = jax.nn.log_softmax(start_l, axis=-1).reshape(B, Tp1, -1) - abstract_pen

    nb = beta.shape[-1]
    act_full = act_logps.reshape(B, Tp1, nb, -1)
    idx = jnp.broadcast_to(actions_batch[:, :, None, None], (B, max_T, nb, 1))
    chosen = jnp.take_along_axis(act_full[:, :max_T], idx, axis=-1)[..., 0]

    f = start[:, 0] + chosen[:, 0]
    fs = [f]
    for i in range(1, max_T):
        f = jnp.logaddexp(
            f + cont[:, i],
            logsumexp(f + beta[:, i], axis=1, keepdims=True) + start[:, i]
        ) + chosen[:, i]
        fs.append(f)
    fs = jnp.stack(fs)                                   # (T, B, nb)
    x0 = fs[lengths - 1, jnp.arange(B)]                  # (B, nb)
    x1 = beta[jnp.arange(B), lengths]                    # (B, nb)
    total = logsumexp(x0 + x1, axis=1)
    return -jnp.sum(total)


# ----------------------------------------------------------------------------
# Deterministic parameter init (synthetic control net)
# ----------------------------------------------------------------------------
def init_params(key, s_dim, hidden, nb, na):
    ks = jax.random.split(key, 5)

    def rnd(k, shape, scale=0.3):
        return scale * jax.random.normal(k, shape, dtype=jnp.float32)

    return dict(
        w1=rnd(ks[0], (s_dim, hidden)),
        b1=jnp.zeros((1, hidden), jnp.float32),
        wa=rnd(ks[1], (nb, hidden, na)),
        ba=jnp.zeros((nb, 1, na), jnp.float32),
        wb=rnd(ks[2], (hidden, nb)),
        bb=jnp.zeros((1, nb), jnp.float32),
        wc=rnd(ks[3], (hidden, nb)),
        bc=jnp.zeros((1, nb), jnp.float32),
        wst=rnd(ks[4], (hidden, nb)),
        bst=jnp.zeros((1, nb), jnp.float32),
    )


if __name__ == "__main__":
    B, MAX_T, S, H, NB, NA = 2, 8, 16, 32, 4, 6

    key = jax.random.PRNGKey(0)
    kp, ks, ka = jax.random.split(key, 3)
    params = init_params(kp, S, H, NB, NA)
    s_i_batch = jax.random.normal(ks, (B, MAX_T + 1, S), dtype=jnp.float32)
    actions_batch = jax.random.randint(ka, (B, MAX_T), 0, NA, dtype=jnp.int32)
    lengths = jnp.array([MAX_T, 5], dtype=jnp.int32)   # must lie in [1, MAX_T]

    fwd = jax.jit(hmm_net_forward)
    loss = jax.block_until_ready(fwd(params, s_i_batch, actions_batch, lengths))

    ref = reference_forward(params, s_i_batch, actions_batch, lengths)
    assert bool(jnp.isfinite(loss)), f"loss not finite: {loss}"
    assert bool(jnp.allclose(loss, ref, rtol=2e-2, atol=2e-2)), (loss, ref)

    print("KERNEL_OK")
</pallas_src>

<mosaic_0001>
module attributes {stable_mosaic.version = 11 : i64} {
  func.func @control_net_kernel(%arg0: i32, %arg1: memref<16x128xf32, #tpu.memory_space<vmem>>, %arg2: memref<24x128xf32, #tpu.memory_space<vmem>>, %arg3: memref<32x16xbf16, #tpu.memory_space<vmem>>, %arg4: memref<32x1xf32, #tpu.memory_space<vmem>>, %arg5: memref<36x32xbf16, #tpu.memory_space<vmem>>, %arg6: memref<36x1xf32, #tpu.memory_space<vmem>>, %arg7: memref<4x24xf32, #tpu.memory_space<vmem>>, %arg8: memref<1x16x128xf32, #tpu.memory_space<vmem>>) attributes {dimension_semantics = [#tpu.dimension_semantics<parallel>], iteration_bounds = array<i64: 9>, scalar_prefetch = 0 : i64, scratch_operands = 0 : i64, tpu.core_type = #tpu.core_type<tc>, window_params = [{transform_indices = @transform_0, window_bounds = array<i64: 16, 128>}, {transform_indices = @transform_1, window_bounds = array<i64: 24, 128>}, {pipeline_mode = #tpu.pipeline_mode<synchronous>, transform_indices = @transform_2, window_bounds = array<i64: 32, 16>}, {pipeline_mode = #tpu.pipeline_mode<synchronous>, transform_indices = @transform_3, window_bounds = array<i64: 32, 1>}, {pipeline_mode = #tpu.pipeline_mode<synchronous>, transform_indices = @transform_4, window_bounds = array<i64: 36, 32>}, {pipeline_mode = #tpu.pipeline_mode<synchronous>, transform_indices = @transform_5, window_bounds = array<i64: 36, 1>}, {pipeline_mode = #tpu.pipeline_mode<synchronous>, transform_indices = @transform_6, window_bounds = array<i64: 4, 24>}, {transform_indices = @transform_7, window_bounds = array<i64: 1, 16, 128>}]} {
    %c0 = arith.constant 0 : index
    %c0_0 = arith.constant 0 : index
    %0 = vector.load %arg3[%c0, %c0_0] : memref<32x16xbf16, #tpu.memory_space<vmem>>, vector<32x16xbf16>
    %c0_1 = arith.constant 0 : index
    %c0_2 = arith.constant 0 : index
    %1 = vector.load %arg1[%c0_1, %c0_2] : memref<16x128xf32, #tpu.memory_space<vmem>>, vector<16x128xf32>
    %2 = arith.truncf %1 : vector<16x128xf32> to vector<16x128xbf16>
    %cst = arith.constant dense<0.000000e+00> : vector<32x128xf32>
    %3 = tpu.matmul %0, %2, %cst {dimension_numbers = #tpu.dot_dimension_numbers<[1], [0], [0], [1], [0, 0, 1, 1], [], []>} : vector<32x16xbf16>, vector<16x128xbf16>, vector<32x128xf32> -> vector<32x128xf32>
    %c0_3 = arith.constant 0 : index
    %c0_4 = arith.constant 0 : index
    %4 = vector.load %arg4[%c0_3, %c0_4] : memref<32x1xf32, #tpu.memory_space<vmem>>, vector<32x1xf32>
    %5 = vector.broadcast %4 : vector<32x1xf32> to vector<32x128xf32>
    %6 = arith.addf %3, %5 : vector<32x128xf32>
    %7 = math.tanh %6 : vector<32x128xf32>
    %c0_5 = arith.constant 0 : index
    %c0_6 = arith.constant 0 : index
    %8 = vector.load %arg5[%c0_5, %c0_6] : memref<36x32xbf16, #tpu.memory_space<vmem>>, vector<36x32xbf16>
    %9 = arith.truncf %7 : vector<32x128xf32> to vector<32x128xbf16>
    %cst_7 = arith.constant dense<0.000000e+00> : vector<36x128xf32>
    %10 = tpu.matmul %8, %9, %cst_7 {dimension_numbers = #tpu.dot_dimension_numbers<[1], [0], [0], [1], [0, 0, 1, 1], [], []>} : vector<36x32xbf16>, vector<32x128xbf16>, vector<36x128xf32> -> vector<36x128xf32>
    %c0_8 = arith.constant 0 : index
    %c0_9 = arith.constant 0 : index
    %11 = vector.load %arg6[%c0_8, %c0_9] : memref<36x1xf32, #tpu.memory_space<vmem>>, vector<36x1xf32>
    %12 = vector.broadcast %11 : vector<36x1xf32> to vector<36x128xf32>
    %13 = arith.addf %10, %12 : vector<36x128xf32>
    %14 = vector.extract_strided_slice %13 {offsets = [0, 0], sizes = [24, 128], strides = [1, 1]} : vector<36x128xf32> to vector<24x128xf32>
    %c0_10 = arith.constant 0 : index
    %c0_11 = arith.constant 0 : index
    %15 = vector.load %arg7[%c0_10, %c0_11] : memref<4x24xf32, #tpu.memory_space<vmem>>, vector<4x24xf32>
    %c0_12 = arith.constant 0 : index
    %c0_13 = arith.constant 0 : index
    %16 = vector.load %arg2[%c0_12, %c0_13] : memref<24x128xf32, #tpu.memory_space<vmem>>, vector<24x128xf32>
    %17 = arith.mulf %14, %16 : vector<24x128xf32>
    %cst_14 = arith.constant dense<0.000000e+00> : vector<4x128xf32>
    %18 = tpu.matmul %15, %17, %cst_14 {dimension_numbers = #tpu.dot_dimension_numbers<[1], [0], [0], [1], [0, 0, 1, 1], [], []>} : vector<4x24xf32>, vector<24x128xf32>, vector<4x128xf32> -> vector<4x128xf32>
    %cst_15 = arith.constant dense<0xFF800000> : vector<128xf32>
    %19 = vector.multi_reduction <maximumf>, %14, %cst_15 [0] : vector<24x128xf32> to vector<128xf32>
    %20 = vector.shape_cast %19 : vector<128xf32> to vector<1x128xf32>
    %21 = vector.broadcast %20 : vector<1x128xf32> to vector<24x128xf32>
    %22 = arith.subf %14, %21 : vector<24x128xf32>
    %23 = math.exp %22 : vector<24x128xf32>
    %cst_16 = arith.constant dense<0.000000e+00> : vector<4x128xf32>
    %24 = tpu.matmul %15, %23, %cst_16 {dimension_numbers = #tpu.dot_dimension_numbers<[1], [0], [0], [1], [0, 0, 1, 1], [], []>} : vector<4x24xf32>, vector<24x128xf32>, vector<4x128xf32> -> vector<4x128xf32>
    %25 = math.log %24 : vector<4x128xf32>
    %26 = vector.broadcast %20 : vector<1x128xf32> to vector<4x128xf32>
    %27 = arith.addf %26, %25 : vector<4x128xf32>
    %28 = arith.subf %18, %27 : vector<4x128xf32>
    %29 = vector.extract_strided_slice %13 {offsets = [24, 0], sizes = [4, 128], strides = [1, 1]} : vector<36x128xf32> to vector<4x128xf32>
    %30 = vector.extract_strided_slice %13 {offsets = [28, 0], sizes = [4, 128], strides = [1, 1]} : vector<36x128xf32> to vector<4x128xf32>
    %31 = vector.extract_strided_slice %13 {offsets = [32, 0], sizes = [4, 128], strides = [1, 1]} : vector<36x128xf32> to vector<4x128xf32>
    %32 = arith.maximumf %29, %30 : vector<4x128xf32>
    %33 = arith.minimumf %29, %30 : vector<4x128xf32>
    %34 = arith.subf %33, %32 : vector<4x128xf32>
    %35 = math.exp %34 : vector<4x128xf32>
    %cst_17 = arith.constant 1.000000e+00 : f32
    %36 = vector.broadcast %cst_17 : f32 to vector<4x128xf32>
    %37 = arith.addf %36, %35 : vector<4x128xf32>
    %38 = math.log %37 : vector<4x128xf32>
    %39 = arith.addf %32, %38 : vector<4x128xf32>
    %cst_18 = arith.constant dense<0xFF800000> : vector<128xf32>
    %40 = vector.multi_reduction <maximumf>, %31, %cst_18 [0] : vector<4x128xf32> to vector<128xf32>
    %41 = vector.shape_cast %40 : vector<128xf32> to vector<1x128xf32>
    %42 = vector.broadcast %41 : vector<1x128xf32> to vector<4x128xf32>
    %43 = arith.subf %31, %42 : vector<4x128xf32>
    %44 = math.exp %43 : vector<4x128xf32>
    %cst_19 = arith.constant dense<0.000000e+00> : vector<128xf32>
    %45 = vector.multi_reduction <add>, %44, %cst_19 [0] : vector<4x128xf32> to vector<128xf32>
    %46 = vector.shape_cast %45 : vector<128xf32> to vector<1x128xf32>
    %47 = math.log %46 : vector<1x128xf32>
    %48 = arith.addf %41, %47 : vector<1x128xf32>
    %49 = vector.broadcast %48 : vector<1x128xf32> to vector<4x128xf32>
    %50 = arith.subf %31, %49 : vector<4x128xf32>
    %cst_20 = arith.constant 5.000000e-01 : f32
    %51 = vector.broadcast %cst_20 : f32 to vector<4x128xf32>
    %52 = arith.subf %50, %51 : vector<4x128xf32>
    %c0_21 = arith.constant 0 : index
    %c0_22 = arith.constant 0 : index
    %c0_23 = arith.constant 0 : index
    %53 = vector.load %arg8[%c0_21, %c0_22, %c0_23] : memref<1x16x128xf32, #tpu.memory_space<vmem>>, vector<1x4x128xf32>
    %54 = vector.shape_cast %53 : vector<1x4x128xf32> to vector<4x128xf32>
    %55 = vector.shape_cast %28 : vector<4x128xf32> to vector<1x4x128xf32>
    tpu.vector_store %arg8[%c0_21, %c0_22, %c0_23], %55 {strides = array<i32>} : memref<1x16x128xf32, #tpu.memory_space<vmem>>, vector<1x4x128xf32>,
    %56 = arith.subf %29, %39 : vector<4x128xf32>
    %c0_24 = arith.constant 0 : index
    %c4 = arith.constant 4 : index
    %c0_25 = arith.constant 0 : index
    %57 = vector.load %arg8[%c0_24, %c4, %c0_25] : memref<1x16x128xf32, #tpu.memory_space<vmem>>, vector<1x4x128xf32>
    %58 = vector.shape_cast %57 : vector<1x4x128xf32> to vector<4x128xf32>
    %59 = vector.shape_cast %56 : vector<4x128xf32> to vector<1x4x128xf32>
    tpu.vector_store %arg8[%c0_24, %c4, %c0_25], %59 {strides = array<i32>} : memref<1x16x128xf32, #tpu.memory_space<vmem>>, vector<1x4x128xf32>,
    %60 = arith.subf %30, %39 : vector<4x128xf32>
    %c0_26 = arith.constant 0 : index
    %c8 = arith.constant 8 : index
    %c0_27 = arith.constant 0 : index
    %61 = vector.load %arg8[%c0_26, %c8, %c0_27] : memref<1x16x128xf32, #tpu.memory_space<vmem>>, vector<1x4x128xf32>
    %62 = vector.shape_cast %61 : vector<1x4x128xf32> to vector<4x128xf32>
    %63 = vector.shape_cast %60 : vector<4x128xf32> to vector<1x4x128xf32>
    tpu.vector_store %arg8[%c0_26, %c8, %c0_27], %63 {strides = array<i32>} : memref<1x16x128xf32, #tpu.memory_space<vmem>>, vector<1x4x128xf32>,
    %c0_28 = arith.constant 0 : index
    %c12 = arith.constant 12 : index
    %c0_29 = arith.constant 0 : index
    %64 = vector.load %arg8[%c0_28, %c12, %c0_29] : memref<1x16x128xf32, #tpu.memory_space<vmem>>, vector<1x4x128xf32>
    %65 = vector.shape_cast %64 : vector<1x4x128xf32> to vector<4x128xf32>
    %66 = vector.shape_cast %52 : vector<4x128xf32> to vector<1x4x128xf32>
    tpu.vector_store %arg8[%c0_28, %c12, %c0_29], %66 {strides = array<i32>} : memref<1x16x128xf32, #tpu.memory_space<vmem>>, vector<1x4x128xf32>,
    return
  }
  func.func @transform_0(%arg0: i32) -> (i32, i32) {
    %c0_i32 = arith.constant 0 : i32
    %c0_i32_0 = arith.constant 0 : i32
    return %c0_i32, %arg0 : i32, i32
  }
  func.func @transform_1(%arg0: i32) -> (i32, i32) {
    %c0_i32 = arith.constant 0 : i32
    %c0_i32_0 = arith.constant 0 : i32
    return %c0_i32, %arg0 : i32, i32
  }
  func.func @transform_2(%arg0: i32) -> (i32, i32) {
    %c0_i32 = arith.constant 0 : i32
    %c0_i32_0 = arith.constant 0 : i32
    %c0_i32_1 = arith.constant 0 : i32
    return %c0_i32, %c0_i32_0 : i32, i32
  }
  func.func @transform_3(%arg0: i32) -> (i32, i32) {
    %c0_i32 = arith.constant 0 : i32
    %c0_i32_0 = arith.constant 0 : i32
    %c0_i32_1 = arith.constant 0 : i32
    return %c0_i32, %c0_i32_0 : i32, i32
  }
  func.func @transform_4(%arg0: i32) -> (i32, i32) {
    %c0_i32 = arith.constant 0 : i32
    %c0_i32_0 = arith.constant 0 : i32
    %c0_i32_1 = arith.constant 0 : i32
    return %c0_i32, %c0_i32_0 : i32, i32
  }
  func.func @transform_5(%arg0: i32) -> (i32, i32) {
    %c0_i32 = arith.constant 0 : i32
    %c0_i32_0 = arith.constant 0 : i32
    %c0_i32_1 = arith.constant 0 : i32
    return %c0_i32, %c0_i32_0 : i32, i32
  }
  func.func @transform_6(%arg0: i32) -> (i32, i32) {
    %c0_i32 = arith.constant 0 : i32
    %c0_i32_0 = arith.constant 0 : i32
    %c0_i32_1 = arith.constant 0 : i32
    return %c0_i32, %c0_i32_0 : i32, i32
  }
  func.func @transform_7(%arg0: i32) -> (i32, i32, i32) {
    %c0_i32 = arith.constant 0 : i32
    %c0_i32_0 = arith.constant 0 : i32
    %c0_i32_1 = arith.constant 0 : i32
    return %arg0, %c0_i32, %c0_i32_0 : i32, i32, i32
  }
}

module attributes {stable_mosaic.version = 11 : i64} {
  func.func @hmm_fw_kernel(%arg0: i32, %arg1: i32, %arg2: memref<1x128xi32, #tpu.memory_space<vmem>>, %arg3: memref<9x16x128xf32, #tpu.memory_space<vmem>>, %arg4: memref<1x128xf32, #tpu.memory_space<vmem>>, %arg5: memref<4x128xf32, #tpu.memory_space<vmem>>, %arg6: memref<4x128xf32, #tpu.memory_space<vmem>>, %arg7: memref<4x128xf32, #tpu.memory_space<vmem>>) attributes {dimension_semantics = [#tpu.dimension_semantics<parallel>, #tpu.dimension_semantics<arbitrary>], iteration_bounds = array<i64: 1, 1>, scalar_prefetch = 0 : i64, scratch_operands = 3 : i64, tpu.core_type = #tpu.core_type<tc>, window_params = [{transform_indices = @transform_0, window_bounds = array<i64: 1, 128>}, {transform_indices = @transform_1, window_bounds = array<i64: 9, 16, 128>}, {transform_indices = @transform_2, window_bounds = array<i64: 1, 128>}]} {
    %c0 = arith.constant 0 : index
    %c0_0 = arith.constant 0 : index
    %0 = vector.load %arg2[%c0, %c0_0] : memref<1x128xi32, #tpu.memory_space<vmem>>, vector<1x128xi32>
    %c0_i32 = arith.constant 0 : i32
    %1 = arith.cmpi eq, %arg1, %c0_i32 : i32
    %2 = arith.extui %1 : i1 to i32
    %cst = arith.constant 0xFF800000 : f32
    %c0_i32_1 = arith.constant 0 : i32
    %3 = arith.cmpi ne, %2, %c0_i32_1 : i32
    scf.if %3 {
      %c0_108 = arith.constant 0 : index
      %c0_109 = arith.constant 0 : index
      %c0_110 = arith.constant 0 : index
      %482 = vector.load %arg3[%c0_108, %c0_109, %c0_110] : memref<9x16x128xf32, #tpu.memory_space<vmem>>, vector<1x16x128xf32>
      %483 = vector.shape_cast %482 : vector<1x16x128xf32> to vector<16x128xf32>
      %484 = vector.extract_strided_slice %483 {offsets = [12, 0], sizes = [4, 128], strides = [1, 1]} : vector<16x128xf32> to vector<4x128xf32>
      %485 = vector.extract_strided_slice %483 {offsets = [0, 0], sizes = [4, 128], strides = [1, 1]} : vector<16x128xf32> to vector<4x128xf32>
      %486 = arith.addf %484, %485 : vector<4x128xf32>
      %c0_111 = arith.constant 0 : index
      %c0_112 = arith.constant 0 : index
      %487 = vector.load %arg5[%c0_111, %c0_112] : memref<4x128xf32, #tpu.memory_space<vmem>>, vector<4x128xf32>
      tpu.vector_store %arg5[%c0_111, %c0_112], %486 {strides = array<i32>} : memref<4x128xf32, #tpu.memory_space<vmem>>, vector<4x128xf32>,
      %c1_i32_113 = arith.constant 1 : i32
      %488 = vector.broadcast %c1_i32_113 : i32 to vector<1x128xi32>
      %489 = arith.cmpi eq, %0, %488 : vector<1x128xi32>
      %490 = vector.broadcast %cst : f32 to vector<4x128xf32>
      %491 = vector.shape_cast %489 : vector<1x128xi1> to vector<1x128xi1>
      %492 = vector.broadcast %491 : vector<1x128xi1> to vector<4x128xi1>
      %493 = arith.select %492, %486, %490 : vector<4x128xi1>, vector<4x128xf32>
      %c0_114 = arith.constant 0 : index
      %c0_115 = arith.constant 0 : index
      %494 = vector.load %arg6[%c0_114, %c0_115] : memref<4x128xf32, #tpu.memory_space<vmem>>, vector<4x128xf32>
      tpu.vector_store %arg6[%c0_114, %c0_115], %493 {strides = array<i32>} : memref<4x128xf32, #tpu.memory_space<vmem>>, vector<4x128xf32>,
      %495 = vector.broadcast %cst : f32 to vector<4x128xf32>
      %c0_116 = arith.constant 0 : index
      %c0_117 = arith.constant 0 : index
      %496 = vector.load %arg7[%c0_116, %c0_117] : memref<4x128xf32, #tpu.memory_space<vmem>>, vector<4x128xf32>
      tpu.vector_store %arg7[%c0_116, %c0_117], %495 {strides = array<i32>} : memref<4x128xf32, #tpu.memory_space<vmem>>, vector<4x128xf32>,
    } else {
    }
    %c9_i32 = arith.constant 9 : i32
    %4 = arith.muli %arg1, %c9_i32 : i32
    %c0_2 = arith.constant 0 : index
    %c0_3 = arith.constant 0 : index
    %5 = vector.load %arg5[%c0_2, %c0_3] : memref<4x128xf32, #tpu.memory_space<vmem>>, vector<4x128xf32>
    %c0_4 = arith.constant 0 : index
    %c0_5 = arith.constant 0 : index
    %6 = vector.load %arg6[%c0_4, %c0_5] : memref<4x128xf32, #tpu.memory_space<vmem>>, vector<4x128xf32>
    %c0_6 = arith.constant 0 : index
    %c0_7 = arith.constant 0 : index
    %7 = vector.load %arg7[%c0_6, %c0_7] : memref<4x128xf32, #tpu.memory_space<vmem>>, vector<4x128xf32>
    %c0_i32_8 = arith.constant 0 : i32
    %8 = arith.addi %4, %c0_i32_8 : i32
    %9 = arith.index_cast %c0_i32_8 : i32 to index
    %c0_9 = arith.constant 0 : index
    %c0_10 = arith.constant 0 : index
    %10 = vector.load %arg3[%9, %c0_9, %c0_10] : memref<9x16x128xf32, #tpu.memory_space<vmem>>, vector<1x16x128xf32>
    %11 = vector.shape_cast %10 : vector<1x16x128xf32> to vector<16x128xf32>
    %12 = vector.extract_strided_slice %11 {offsets = [0, 0], sizes = [4, 128], strides = [1, 1]} : vector<16x128xf32> to vector<4x128xf32>
    %13 = vector.extract_strided_slice %11 {offsets = [4, 0], sizes = [4, 128], strides = [1, 1]} : vector<16x128xf32> to vector<4x128xf32>
    %14 = vector.extract_strided_slice %11 {offsets = [8, 0], sizes = [4, 128], strides = [1, 1]} : vector<16x128xf32> to vector<4x128xf32>
    %15 = vector.extract_strided_slice %11 {offsets = [12, 0], sizes = [4, 128], strides = [1, 1]} : vector<16x128xf32> to vector<4x128xf32>
    %c1_i32 = arith.constant 1 : i32
    %16 = arith.cmpi sge, %8, %c1_i32 : i32
    %c8_i32 = arith.constant 8 : i32
    %17 = arith.cmpi sle, %8, %c8_i32 : i32
    %18 = arith.andi %16, %17 : i1
    %19 = vector.broadcast %8 : i32 to vector<1x128xi32>
    %20 = arith.cmpi eq, %0, %19 : vector<1x128xi32>
    %21 = vector.broadcast %18 : i1 to vector<1x128xi1>
    %22 = arith.andi %21, %20 : vector<1x128xi1>
    %23 = vector.shape_cast %22 : vector<1x128xi1> to vector<1x128xi1>
    %24 = vector.broadcast %23 : vector<1x128xi1> to vector<4x128xi1>
    %25 = arith.select %24, %13, %7 : vector<4x128xi1>, vector<4x128xf32>
    %26 = arith.addf %5, %13 : vector<4x128xf32>
    %cst_11 = arith.constant dense<0xFF800000> : vector<128xf32>
    %27 = vector.multi_reduction <maximumf>, %26, %cst_11 [0] : vector<4x128xf32> to vector<128xf32>
    %28 = vector.shape_cast %27 : vector<128xf32> to vector<1x128xf32>
    %29 = vector.broadcast %28 : vector<1x128xf32> to vector<4x128xf32>
    %30 = arith.subf %26, %29 : vector<4x128xf32>
    %31 = math.exp %30 : vector<4x128xf32>
    %cst_12 = arith.constant dense<0.000000e+00> : vector<128xf32>
    %32 = vector.multi_reduction <add>, %31, %cst_12 [0] : vector<4x128xf32> to vector<128xf32>
    %33 = vector.shape_cast %32 : vector<128xf32> to vector<1x128xf32>
    %34 = math.log %33 : vector<1x128xf32>
    %35 = arith.addf %28, %34 : vector<1x128xf32>
    %36 = arith.addf %5, %14 : vector<4x128xf32>
    %37 = vector.broadcast %35 : vector<1x128xf32> to vector<4x128xf32>
    %38 = arith.addf %37, %15 : vector<4x128xf32>
    %39 = arith.maximumf %36, %38 : vector<4x128xf32>
    %40 = arith.minimumf %36, %38 : vector<4x128xf32>
    %41 = arith.subf %40, %39 : vector<4x128xf32>
    %42 = math.exp %41 : vector<4x128xf32>
    %cst_13 = arith.constant 1.000000e+00 : f32
    %43 = vector.broadcast %cst_13 : f32 to vector<4x128xf32>
    %44 = arith.addf %43, %42 : vector<4x128xf32>
    %45 = math.log %44 : vector<4x128xf32>
    %46 = arith.addf %39, %45 : vector<4x128xf32>
    %47 = arith.addf %46, %12 : vector<4x128xf32>
    %c1_i32_14 = arith.constant 1 : i32
    %48 = arith.cmpi sge, %8, %c1_i32_14 : i32
    %c7_i32 = arith.constant 7 : i32
    %49 = arith.cmpi sle, %8, %c7_i32 : i32
    %50 = arith.andi %48, %49 : i1
    %51 = arith.select %50, %47, %5 : vector<4x128xf32>
    %c1_i32_15 = arith.constant 1 : i32
    %52 = arith.addi %8, %c1_i32_15 : i32
    %53 = vector.broadcast %52 : i32 to vector<1x128xi32>
    %54 = arith.cmpi eq, %0, %53 : vector<1x128xi32>
    %55 = vector.broadcast %50 : i1 to vector<1x128xi1>
    %56 = arith.andi %55, %54 : vector<1x128xi1>
    %57 = vector.shape_cast %56 : vector<1x128xi1> to vector<1x128xi1>
    %58 = vector.broadcast %57 : vector<1x128xi1> to vector<4x128xi1>
    %59 = arith.select %58, %47, %6 : vector<4x128xi1>, vector<4x128xf32>
    %c1_i32_16 = arith.constant 1 : i32
    %60 = arith.addi %4, %c1_i32_16 : i32
    %61 = arith.index_cast %c1_i32_16 : i32 to index
    %c0_17 = arith.constant 0 : index
    %c0_18 = arith.constant 0 : index
    %62 = vector.load %arg3[%61, %c0_17, %c0_18] : memref<9x16x128xf32, #tpu.memory_space<vmem>>, vector<1x16x128xf32>
    %63 = vector.shape_cast %62 : vector<1x16x128xf32> to vector<16x128xf32>
    %64 = vector.extract_strided_slice %63 {offsets = [0, 0], sizes = [4, 128], strides = [1, 1]} : vector<16x128xf32> to vector<4x128xf32>
    %65 = vector.extract_strided_slice %63 {offsets = [4, 0], sizes = [4, 128], strides = [1, 1]} : vector<16x128xf32> to vector<4x128xf32>
    %66 = vector.extract_strided_slice %63 {offsets = [8, 0], sizes = [4, 128], strides = [1, 1]} : vector<16x128xf32> to vector<4x128xf32>
    %67 = vector.extract_strided_slice %63 {offsets = [12, 0], sizes = [4, 128], strides = [1, 1]} : vector<16x128xf32> to vector<4x128xf32>
    %c1_i32_19 = arith.constant 1 : i32
    %68 = arith.cmpi sge, %60, %c1_i32_19 : i32
    %c8_i32_20 = arith.constant 8 : i32
    %69 = arith.cmpi sle, %60, %c8_i32_20 : i32
    %70 = arith.andi %68, %69 : i1
    %71 = vector.broadcast %60 : i32 to vector<1x128xi32>
    %72 = arith.cmpi eq, %0, %71 : vector<1x128xi32>
    %73 = vector.broadcast %70 : i1 to vector<1x128xi1>
    %74 = arith.andi %73, %72 : vector<1x128xi1>
    %75 = vector.shape_cast %74 : vector<1x128xi1> to vector<1x128xi1>
    %76 = vector.broadcast %75 : vector<1x128xi1> to vector<4x128xi1>
    %77 = arith.select %76, %65, %25 : vector<4x128xi1>, vector<4x128xf32>
    %78 = arith.addf %51, %65 : vector<4x128xf32>
    %cst_21 = arith.constant dense<0xFF800000> : vector<128xf32>
    %79 = vector.multi_reduction <maximumf>, %78, %cst_21 [0] : vector<4x128xf32> to vector<128xf32>
    %80 = vector.shape_cast %79 : vector<128xf32> to vector<1x128xf32>
    %81 = vector.broadcast %80 : vector<1x128xf32> to vector<4x128xf32>
    %82 = arith.subf %78, %81 : vector<4x128xf32>
    %83 = math.exp %82 : vector<4x128xf32>
    %cst_22 = arith.constant dense<0.000000e+00> : vector<128xf32>
    %84 = vector.multi_reduction <add>, %83, %cst_22 [0] : vector<4x128xf32> to vector<128xf32>
    %85 = vector.shape_cast %84 : vector<128xf32> to vector<1x128xf32>
    %86 = math.log %85 : vector<1x128xf32>
    %87 = arith.addf %80, %86 : vector<1x128xf32>
    %88 = arith.addf %51, %66 : vector<4x128xf32>
    %89 = vector.broadcast %87 : vector<1x128xf32> to vector<4x128xf32>
    %90 = arith.addf %89, %67 : vector<4x128xf32>
    %91 = arith.maximumf %88, %90 : vector<4x128xf32>
    %92 = arith.minimumf %88, %90 : vector<4x128xf32>
    %93 = arith.subf %92, %91 : vector<4x128xf32>
    %94 = math.exp %93 : vector<4x128xf32>
    %cst_23 = arith.constant 1.000000e+00 : f32
    %95 = vector.broadcast %cst_23 : f32 to vector<4x128xf32>
    %96 = arith.addf %95, %94 : vector<4x128xf32>
    %97 = math.log %96 : vector<4x128xf32>
    %98 = arith.addf %91, %97 : vector<4x128xf32>
    %99 = arith.addf %98, %64 : vector<4x128xf32>
    %c1_i32_24 = arith.constant 1 : i32
    %100 = arith.cmpi sge, %60, %c1_i32_24 : i32
    %c7_i32_25 = arith.constant 7 : i32
    %101 = arith.cmpi sle, %60, %c7_i32_25 : i32
    %102 = arith.andi %100, %101 : i1
    %103 = arith.select %102, %99, %51 : vector<4x128xf32>
    %c1_i32_26 = arith.constant 1 : i32
    %104 = arith.addi %60, %c1_i32_26 : i32
    %105 = vector.broadcast %104 : i32 to vector<1x128xi32>
    %106 = arith.cmpi eq, %0, %105 : vector<1x128xi32>
    %107 = vector.broadcast %102 : i1 to vector<1x128xi1>
    %108 = arith.andi %107, %106 : vector<1x128xi1>
    %109 = vector.shape_cast %108 : vector<1x128xi1> to vector<1x128xi1>
    %110 = vector.broadcast %109 : vector<1x128xi1> to vector<4x128xi1>
    %111 = arith.select %110, %99, %59 : vector<4x128xi1>, vector<4x128xf32>
    %c2_i32 = arith.constant 2 : i32
    %112 = arith.addi %4, %c2_i32 : i32
    %113 = arith.index_cast %c2_i32 : i32 to index
    %c0_27 = arith.constant 0 : index
    %c0_28 = arith.constant 0 : index
    %114 = vector.load %arg3[%113, %c0_27, %c0_28] : memref<9x16x128xf32, #tpu.memory_space<vmem>>, vector<1x16x128xf32>
    %115 = vector.shape_cast %114 : vector<1x16x128xf32> to vector<16x128xf32>
    %116 = vector.extract_strided_slice %115 {offsets = [0, 0], sizes = [4, 128], strides = [1, 1]} : vector<16x128xf32> to vector<4x128xf32>
    %117 = vector.extract_strided_slice %115 {offsets = [4, 0], sizes = [4, 128], strides = [1, 1]} : vector<16x128xf32> to vector<4x128xf32>
    %118 = vector.extract_strided_slice %115 {offsets = [8, 0], sizes = [4, 128], strides = [1, 1]} : vector<16x128xf32> to vector<4x128xf32>
    %119 = vector.extract_strided_slice %115 {offsets = [12, 0], sizes = [4, 128], strides = [1, 1]} : vector<16x128xf32> to vector<4x128xf32>
    %c1_i32_29 = arith.constant 1 : i32
    %120 = arith.cmpi sge, %112, %c1_i32_29 : i32
    %c8_i32_30 = arith.constant 8 : i32
    %121 = arith.cmpi sle, %112, %c8_i32_30 : i32
    %122 = arith.andi %120, %121 : i1
    %123 = vector.broadcast %112 : i32 to vector<1x128xi32>
    %124 = arith.cmpi eq, %0, %123 : vector<1x128xi32>
    %125 = vector.broadcast %122 : i1 to vector<1x128xi1>
    %126 = arith.andi %125, %124 : vector<1x128xi1>
    %127 = vector.shape_cast %126 : vector<1x128xi1> to vector<1x128xi1>
    %128 = vector.broadcast %127 : vector<1x128xi1> to vector<4x128xi1>
    %129 = arith.select %128, %117, %77 : vector<4x128xi1>, vector<4x128xf32>
    %130 = arith.addf %103, %117 : vector<4x128xf32>
    %cst_31 = arith.constant dense<0xFF800000> : vector<128xf32>
    %131 = vector.multi_reduction <maximumf>, %130, %cst_31 [0] : vector<4x128xf32> to vector<128xf32>
    %132 = vector.shape_cast %131 : vector<128xf32> to vector<1x128xf32>
    %133 = vector.broadcast %132 : vector<1x128xf32> to vector<4x128xf32>
    %134 = arith.subf %130, %133 : vector<4x128xf32>
    %135 = math.exp %134 : vector<4x128xf32>
    %cst_32 = arith.constant dense<0.000000e+00> : vector<128xf32>
    %136 = vector.multi_reduction <add>, %135, %cst_32 [0] : vector<4x128xf32> to vector<128xf32>
    %137 = vector.shape_cast %136 : vector<128xf32> to vector<1x128xf32>
    %138 = math.log %137 : vector<1x128xf32>
    %139 = arith.addf %132, %138 : vector<1x128xf32>
    %140 = arith.addf %103, %118 : vector<4x128xf32>
    %141 = vector.broadcast %139 : vector<1x128xf32> to vector<4x128xf32>
    %142 = arith.addf %141, %119 : vector<4x128xf32>
    %143 = arith.maximumf %140, %142 : vector<4x128xf32>
    %144 = arith.minimumf %140, %142 : vector<4x128xf32>
    %145 = arith.subf %144, %143 : vector<4x128xf32>
    %146 = math.exp %145 : vector<4x128xf32>
    %cst_33 = arith.constant 1.000000e+00 : f32
    %147 = vector.broadcast %cst_33 : f32 to vector<4x128xf32>
    %148 = arith.addf %147, %146 : vector<4x128xf32>
    %149 = math.log %148 : vector<4x128xf32>
    %150 = arith.addf %143, %149 : vector<4x128xf32>
    %151 = arith.addf %150, %116 : vector<4x128xf32>
    %c1_i32_34 = arith.constant 1 : i32
    %152 = arith.cmpi sge, %112, %c1_i32_34 : i32
    %c7_i32_35 = arith.constant 7 : i32
    %153 = arith.cmpi sle, %112, %c7_i32_35 : i32
    %154 = arith.andi %152, %153 : i1
    %155 = arith.select %154, %151, %103 : vector<4x128xf32>
    %c1_i32_36 = arith.constant 1 : i32
    %156 = arith.addi %112, %c1_i32_36 : i32
    %157 = vector.broadcast %156 : i32 to vector<1x128xi32>
    %158 = arith.cmpi eq, %0, %157 : vector<1x128xi32>
    %159 = vector.broadcast %154 : i1 to vector<1x128xi1>
    %160 = arith.andi %159, %158 : vector<1x128xi1>
    %161 = vector.shape_cast %160 : vector<1x128xi1> to vector<1x128xi1>
    %162 = vector.broadcast %161 : vector<1x128xi1> to vector<4x128xi1>
    %163 = arith.select %162, %151, %111 : vector<4x128xi1>, vector<4x128xf32>
    %c3_i32 = arith.constant 3 : i32
    %164 = arith.addi %4, %c3_i32 : i32
    %165 = arith.index_cast %c3_i32 : i32 to index
    %c0_37 = arith.constant 0 : index
    %c0_38 = arith.constant 0 : index
    %166 = vector.load %arg3[%165, %c0_37, %c0_38] : memref<9x16x128xf32, #tpu.memory_space<vmem>>, vector<1x16x128xf32>
    %167 = vector.shape_cast %166 : vector<1x16x128xf32> to vector<16x128xf32>
    %168 = vector.extract_strided_slice %167 {offsets = [0, 0], sizes = [4, 128], strides = [1, 1]} : vector<16x128xf32> to vector<4x128xf32>
    %169 = vector.extract_strided_slice %167 {offsets = [4, 0], sizes = [4, 128], strides = [1, 1]} : vector<16x128xf32> to vector<4x128xf32>
    %170 = vector.extract_strided_slice %167 {offsets = [8, 0], sizes = [4, 128], strides = [1, 1]} : vector<16x128xf32> to vector<4x128xf32>
    %171 = vector.extract_strided_slice %167 {offsets = [12, 0], sizes = [4, 128], strides = [1, 1]} : vector<16x128xf32> to vector<4x128xf32>
    %c1_i32_39 = arith.constant 1 : i32
    %172 = arith.cmpi sge, %164, %c1_i32_39 : i32
    %c8_i32_40 = arith.constant 8 : i32
    %173 = arith.cmpi sle, %164, %c8_i32_40 : i32
    %174 = arith.andi %172, %173 : i1
    %175 = vector.broadcast %164 : i32 to vector<1x128xi32>
    %176 = arith.cmpi eq, %0, %175 : vector<1x128xi32>
    %177 = vector.broadcast %174 : i1 to vector<1x128xi1>
    %178 = arith.andi %177, %176 : vector<1x128xi1>
    %179 = vector.shape_cast %178 : vector<1x128xi1> to vector<1x128xi1>
    %180 = vector.broadcast %179 : vector<1x128xi1> to vector<4x128xi1>
    %181 = arith.select %180, %169, %129 : vector<4x128xi1>, vector<4x128xf32>
    %182 = arith.addf %155, %169 : vector<4x128xf32>
    %cst_41 = arith.constant dense<0xFF800000> : vector<128xf32>
    %183 = vector.multi_reduction <maximumf>, %182, %cst_41 [0] : vector<4x128xf32> to vector<128xf32>
    %184 = vector.shape_cast %183 : vector<128xf32> to vector<1x128xf32>
    %185 = vector.broadcast %184 : vector<1x128xf32> to vector<4x128xf32>
    %186 = arith.subf %182, %185 : vector<4x128xf32>
    %187 = math.exp %186 : vector<4x128xf32>
    %cst_42 = arith.constant dense<0.000000e+00> : vector<128xf32>
    %188 = vector.multi_reduction <add>, %187, %cst_42 [0] : vector<4x128xf32> to vector<128xf32>
    %189 = vector.shape_cast %188 : vector<128xf32> to vector<1x128xf32>
    %190 = math.log %189 : vector<1x128xf32>
    %191 = arith.addf %184, %190 : vector<1x128xf32>
    %192 = arith.addf %155, %170 : vector<4x128xf32>
    %193 = vector.broadcast %191 : vector<1x128xf32> to vector<4x128xf32>
    %194 = arith.addf %193, %171 : vector<4x128xf32>
    %195 = arith.maximumf %192, %194 : vector<4x128xf32>
    %196 = arith.minimumf %192, %194 : vector<4x128xf32>
    %197 = arith.subf %196, %195 : vector<4x128xf32>
    %198 = math.exp %197 : vector<4x128xf32>
    %cst_43 = arith.constant 1.000000e+00 : f32
    %199 = vector.broadcast %cst_43 : f32 to vector<4x128xf32>
    %200 = arith.addf %199, %198 : vector<4x128xf32>
    %201 = math.log %200 : vector<4x128xf32>
    %202 = arith.addf %195, %201 : vector<4x128xf32>
    %203 = arith.addf %202, %168 : vector<4x128xf32>
    %c1_i32_44 = arith.constant 1 : i32
    %204 = arith.cmpi sge, %164, %c1_i32_44 : i32
    %c7_i32_45 = arith.constant 7 : i32
    %205 = arith.cmpi sle, %164, %c7_i32_45 : i32
    %206 = arith.andi %204, %205 : i1
    %207 = arith.select %206, %203, %155 : vector<4x128xf32>
    %c1_i32_46 = arith.constant 1 : i32
    %208 = arith.addi %164, %c1_i32_46 : i32
    %209 = vector.broadcast %208 : i32 to vector<1x128xi32>
    %210 = arith.cmpi eq, %0, %209 : vector<1x128xi32>
    %211 = vector.broadcast %206 : i1 to vector<1x128xi1>
    %212 = arith.andi %211, %210 : vector<1x128xi1>
    %213 = vector.shape_cast %212 : vector<1x128xi1> to vector<1x128xi1>
    %214 = vector.broadcast %213 : vector<1x128xi1> to vector<4x128xi1>
    %215 = arith.select %214, %203, %163 : vector<4x128xi1>, vector<4x128xf32>
    %c4_i32 = arith.constant 4 : i32
    %216 = arith.addi %4, %c4_i32 : i32
    %217 = arith.index_cast %c4_i32 : i32 to index
    %c0_47 = arith.constant 0 : index
    %c0_48 = arith.constant 0 : index
    %218 = vector.load %arg3[%217, %c0_47, %c0_48] : memref<9x16x128xf32, #tpu.memory_space<vmem>>, vector<1x16x128xf32>
    %219 = vector.shape_cast %218 : vector<1x16x128xf32> to vector<16x128xf32>
    %220 = vector.extract_strided_slice %219 {offsets = [0, 0], sizes = [4, 128], strides = [1, 1]} : vector<16x128xf32> to vector<4x128xf32>
    %221 = vector.extract_strided_slice %219 {offsets = [4, 0], sizes = [4, 128], strides = [1, 1]} : vector<16x128xf32> to vector<4x128xf32>
    %222 = vector.extract_strided_slice %219 {offsets = [8, 0], sizes = [4, 128], strides = [1, 1]} : vector<16x128xf32> to vector<4x128xf32>
    %223 = vector.extract_strided_slice %219 {offsets = [12, 0], sizes = [4, 128], strides = [1, 1]} : vector<16x128xf32> to vector<4x128xf32>
    %c1_i32_49 = arith.constant 1 : i32
    %224 = arith.cmpi sge, %216, %c1_i32_49 : i32
    %c8_i32_50 = arith.constant 8 : i32
    %225 = arith.cmpi sle, %216, %c8_i32_50 : i32
    %226 = arith.andi %224, %225 : i1
    %227 = vector.broadcast %216 : i32 to vector<1x128xi32>
    %228 = arith.cmpi eq, %0, %227 : vector<1x128xi32>
    %229 = vector.broadcast %226 : i1 to vector<1x128xi1>
    %230 = arith.andi %229, %228 : vector<1x128xi1>
    %231 = vector.shape_cast %230 : vector<1x128xi1> to vector<1x128xi1>
    %232 = vector.broadcast %231 : vector<1x128xi1> to vector<4x128xi1>
    %233 = arith.select %232, %221, %181 : vector<4x128xi1>, vector<4x128xf32>
    %234 = arith.addf %207, %221 : vector<4x128xf32>
    %cst_51 = arith.constant dense<0xFF800000> : vector<128xf32>
    %235 = vector.multi_reduction <maximumf>, %234, %cst_51 [0] : vector<4x128xf32> to vector<128xf32>
    %236 = vector.shape_cast %235 : vector<128xf32> to vector<1x128xf32>
    %237 = vector.broadcast %236 : vector<1x128xf32> to vector<4x128xf32>
    %238 = arith.subf %234, %237 : vector<4x128xf32>
    %239 = math.exp %238 : vector<4x128xf32>
    %cst_52 = arith.constant dense<0.000000e+00> : vector<128xf32>
    %240 = vector.multi_reduction <add>, %239, %cst_52 [0] : vector<4x128xf32> to vector<128xf32>
    %241 = vector.shape_cast %240 : vector<128xf32> to vector<1x128xf32>
    %242 = math.log %241 : vector<1x128xf32>
    %243 = arith.addf %236, %242 : vector<1x128xf32>
    %244 = arith.addf %207, %222 : vector<4x128xf32>
    %245 = vector.broadcast %243 : vector<1x128xf32> to vector<4x128xf32>
    %246 = arith.addf %245, %223 : vector<4x128xf32>
    %247 = arith.maximumf %244, %246 : vector<4x128xf32>
    %248 = arith.minimumf %244, %246 : vector<4x128xf32>
    %249 = arith.subf %248, %247 : vector<4x128xf32>
    %250 = math.exp %249 : vector<4x128xf32>
    %cst_53 = arith.constant 1.000000e+00 : f32
    %251 = vector.broadcast %cst_53 : f32 to vector<4x128xf32>
    %252 = arith.addf %251, %250 : vector<4x128xf32>
    %253 = math.log %252 : vector<4x128xf32>
    %254 = arith.addf %247, %253 : vector<4x128xf32>
    %255 = arith.addf %254, %220 : vector<4x128xf32>
    %c1_i32_54 = arith.constant 1 : i32
    %256 = arith.cmpi sge, %216, %c1_i32_54 : i32
    %c7_i32_55 = arith.constant 7 : i32
    %257 = arith.cmpi sle, %216, %c7_i32_55 : i32
    %258 = arith.andi %256, %257 : i1
    %259 = arith.select %258, %255, %207 : vector<4x128xf32>
    %c1_i32_56 = arith.constant 1 : i32
    %260 = arith.addi %216, %c1_i32_56 : i32
    %261 = vector.broadcast %260 : i32 to vector<1x128xi32>
    %262 = arith.cmpi eq, %0, %261 : vector<1x128xi32>
    %263 = vector.broadcast %258 : i1 to vector<1x128xi1>
    %264 = arith.andi %263, %262 : vector<1x128xi1>
    %265 = vector.shape_cast %264 : vector<1x128xi1> to vector<1x128xi1>
    %266 = vector.broadcast %265 : vector<1x128xi1> to vector<4x128xi1>
    %267 = arith.select %266, %255, %215 : vector<4x128xi1>, vector<4x128xf32>
    %c5_i32 = arith.constant 5 : i32
    %268 = arith.addi %4, %c5_i32 : i32
    %269 = arith.index_cast %c5_i32 : i32 to index
    %c0_57 = arith.constant 0 : index
    %c0_58 = arith.constant 0 : index
    %270 = vector.load %arg3[%269, %c0_57, %c0_58] : memref<9x16x128xf32, #tpu.memory_space<vmem>>, vector<1x16x128xf32>
    %271 = vector.shape_cast %270 : vector<1x16x128xf32> to vector<16x128xf32>
    %272 = vector.extract_strided_slice %271 {offsets = [0, 0], sizes = [4, 128], strides = [1, 1]} : vector<16x128xf32> to vector<4x128xf32>
    %273 = vector.extract_strided_slice %271 {offsets = [4, 0], sizes = [4, 128], strides = [1, 1]} : vector<16x128xf32> to vector<4x128xf32>
    %274 = vector.extract_strided_slice %271 {offsets = [8, 0], sizes = [4, 128], strides = [1, 1]} : vector<16x128xf32> to vector<4x128xf32>
    %275 = vector.extract_strided_slice %271 {offsets = [12, 0], sizes = [4, 128], strides = [1, 1]} : vector<16x128xf32> to vector<4x128xf32>
    %c1_i32_59 = arith.constant 1 : i32
    %276 = arith.cmpi sge, %268, %c1_i32_59 : i32
    %c8_i32_60 = arith.constant 8 : i32
    %277 = arith.cmpi sle, %268, %c8_i32_60 : i32
    %278 = arith.andi %276, %277 : i1
    %279 = vector.broadcast %268 : i32 to vector<1x128xi32>
    %280 = arith.cmpi eq, %0, %279 : vector<1x128xi32>
    %281 = vector.broadcast %278 : i1 to vector<1x128xi1>
    %282 = arith.andi %281, %280 : vector<1x128xi1>
    %283 = vector.shape_cast %282 : vector<1x128xi1> to vector<1x128xi1>
    %284 = vector.broadcast %283 : vector<1x128xi1> to vector<4x128xi1>
    %285 = arith.select %284, %273, %233 : vector<4x128xi1>, vector<4x128xf32>
    %286 = arith.addf %259, %273 : vector<4x128xf32>
    %cst_61 = arith.constant dense<0xFF800000> : vector<128xf32>
    %287 = vector.multi_reduction <maximumf>, %286, %cst_61 [0] : vector<4x128xf32> to vector<128xf32>
    %288 = vector.shape_cast %287 : vector<128xf32> to vector<1x128xf32>
    %289 = vector.broadcast %288 : vector<1x128xf32> to vector<4x128xf32>
    %290 = arith.subf %286, %289 : vector<4x128xf32>
    %291 = math.exp %290 : vector<4x128xf32>
    %cst_62 = arith.constant dense<0.000000e+00> : vector<128xf32>
    %292 = vector.multi_reduction <add>, %291, %cst_62 [0] : vector<4x128xf32> to vector<128xf32>
    %293 = vector.shape_cast %292 : vector<128xf32> to vector<1x128xf32>
    %294 = math.log %293 : vector<1x128xf32>
    %295 = arith.addf %288, %294 : vector<1x128xf32>
    %296 = arith.addf %259, %274 : vector<4x128xf32>
    %297 = vector.broadcast %295 : vector<1x128xf32> to vector<4x128xf32>
    %298 = arith.addf %297, %275 : vector<4x128xf32>
    %299 = arith.maximumf %296, %298 : vector<4x128xf32>
    %300 = arith.minimumf %296, %298 : vector<4x128xf32>
    %301 = arith.subf %300, %299 : vector<4x128xf32>
    %302 = math.exp %301 : vector<4x128xf32>
    %cst_63 = arith.constant 1.000000e+00 : f32
    %303 = vector.broadcast %cst_63 : f32 to vector<4x128xf32>
    %304 = arith.addf %303, %302 : vector<4x128xf32>
    %305 = math.log %304 : vector<4x128xf32>
    %306 = arith.addf %299, %305 : vector<4x128xf32>
    %307 = arith.addf %306, %272 : vector<4x128xf32>
    %c1_i32_64 = arith.constant 1 : i32
    %308 = arith.cmpi sge, %268, %c1_i32_64 : i32
    %c7_i32_65 = arith.constant 7 : i32
    %309 = arith.cmpi sle, %268, %c7_i32_65 : i32
    %310 = arith.andi %308, %309 : i1
    %311 = arith.select %310, %307, %259 : vector<4x128xf32>
    %c1_i32_66 = arith.constant 1 : i32
    %312 = arith.addi %268, %c1_i32_66 : i32
    %313 = vector.broadcast %312 : i32 to vector<1x128xi32>
    %314 = arith.cmpi eq, %0, %313 : vector<1x128xi32>
    %315 = vector.broadcast %310 : i1 to vector<1x128xi1>
    %316 = arith.andi %315, %314 : vector<1x128xi1>
    %317 = vector.shape_cast %316 : vector<1x128xi1> to vector<1x128xi1>
    %318 = vector.broadcast %317 : vector<1x128xi1> to vector<4x128xi1>
    %319 = arith.select %318, %307, %267 : vector<4x128xi1>, vector<4x128xf32>
    %c6_i32 = arith.constant 6 : i32
    %320 = arith.addi %4, %c6_i32 : i32
    %321 = arith.index_cast %c6_i32 : i32 to index
    %c0_67 = arith.constant 0 : index
    %c0_68 = arith.constant 0 : index
    %322 = vector.load %arg3[%321, %c0_67, %c0_68] : memref<9x16x128xf32, #tpu.memory_space<vmem>>, vector<1x16x128xf32>
    %323 = vector.shape_cast %322 : vector<1x16x128xf32> to vector<16x128xf32>
    %324 = vector.extract_strided_slice %323 {offsets = [0, 0], sizes = [4, 128], strides = [1, 1]} : vector<16x128xf32> to vector<4x128xf32>
    %325 = vector.extract_strided_slice %323 {offsets = [4, 0], sizes = [4, 128], strides = [1, 1]} : vector<16x128xf32> to vector<4x128xf32>
    %326 = vector.extract_strided_slice %323 {offsets = [8, 0], sizes = [4, 128], strides = [1, 1]} : vector<16x128xf32> to vector<4x128xf32>
    %327 = vector.extract_strided_slice %323 {offsets = [12, 0], sizes = [4, 128], strides = [1, 1]} : vector<16x128xf32> to vector<4x128xf32>
    %c1_i32_69 = arith.constant 1 : i32
    %328 = arith.cmpi sge, %320, %c1_i32_69 : i32
    %c8_i32_70 = arith.constant 8 : i32
    %329 = arith.cmpi sle, %320, %c8_i32_70 : i32
    %330 = arith.andi %328, %329 : i1
    %331 = vector.broadcast %320 : i32 to vector<1x128xi32>
    %332 = arith.cmpi eq, %0, %331 : vector<1x128xi32>
    %333 = vector.broadcast %330 : i1 to vector<1x128xi1>
    %334 = arith.andi %333, %332 : vector<1x128xi1>
    %335 = vector.shape_cast %334 : vector<1x128xi1> to vector<1x128xi1>
    %336 = vector.broadcast %335 : vector<1x128xi1> to vector<4x128xi1>
    %337 = arith.select %336, %325, %285 : vector<4x128xi1>, vector<4x128xf32>
    %338 = arith.addf %311, %325 : vector<4x128xf32>
    %cst_71 = arith.constant dense<0xFF800000> : vector<128xf32>
    %339 = vector.multi_reduction <maximumf>, %338, %cst_71 [0] : vector<4x128xf32> to vector<128xf32>
    %340 = vector.shape_cast %339 : vector<128xf32> to vector<1x128xf32>
    %341 = vector.broadcast %340 : vector<1x128xf32> to vector<4x128xf32>
    %342 = arith.subf %338, %341 : vector<4x128xf32>
    %343 = math.exp %342 : vector<4x128xf32>
    %cst_72 = arith.constant dense<0.000000e+00> : vector<128xf32>
    %344 = vector.multi_reduction <add>, %343, %cst_72 [0] : vector<4x128xf32> to vector<128xf32>
    %345 = vector.shape_cast %344 : vector<128xf32> to vector<1x128xf32>
    %346 = math.log %345 : vector<1x128xf32>
    %347 = arith.addf %340, %346 : vector<1x128xf32>
    %348 = arith.addf %311, %326 : vector<4x128xf32>
    %349 = vector.broadcast %347 : vector<1x128xf32> to vector<4x128xf32>
    %350 = arith.addf %349, %327 : vector<4x128xf32>
    %351 = arith.maximumf %348, %350 : vector<4x128xf32>
    %352 = arith.minimumf %348, %350 : vector<4x128xf32>
    %353 = arith.subf %352, %351 : vector<4x128xf32>
    %354 = math.exp %353 : vector<4x128xf32>
    %cst_73 = arith.constant 1.000000e+00 : f32
    %355 = vector.broadcast %cst_73 : f32 to vector<4x128xf32>
    %356 = arith.addf %355, %354 : vector<4x128xf32>
    %357 = math.log %356 : vector<4x128xf32>
    %358 = arith.addf %351, %357 : vector<4x128xf32>
    %359 = arith.addf %358, %324 : vector<4x128xf32>
    %c1_i32_74 = arith.constant 1 : i32
    %360 = arith.cmpi sge, %320, %c1_i32_74 : i32
    %c7_i32_75 = arith.constant 7 : i32
    %361 = arith.cmpi sle, %320, %c7_i32_75 : i32
    %362 = arith.andi %360, %361 : i1
    %363 = arith.select %362, %359, %311 : vector<4x128xf32>
    %c1_i32_76 = arith.constant 1 : i32
    %364 = arith.addi %320, %c1_i32_76 : i32
    %365 = vector.broadcast %364 : i32 to vector<1x128xi32>
    %366 = arith.cmpi eq, %0, %365 : vector<1x128xi32>
    %367 = vector.broadcast %362 : i1 to vector<1x128xi1>
    %368 = arith.andi %367, %366 : vector<1x128xi1>
    %369 = vector.shape_cast %368 : vector<1x128xi1> to vector<1x128xi1>
    %370 = vector.broadcast %369 : vector<1x128xi1> to vector<4x128xi1>
    %371 = arith.select %370, %359, %319 : vector<4x128xi1>, vector<4x128xf32>
    %c7_i32_77 = arith.constant 7 : i32
    %372 = arith.addi %4, %c7_i32_77 : i32
    %373 = arith.index_cast %c7_i32_77 : i32 to index
    %c0_78 = arith.constant 0 : index
    %c0_79 = arith.constant 0 : index
    %374 = vector.load %arg3[%373, %c0_78, %c0_79] : memref<9x16x128xf32, #tpu.memory_space<vmem>>, vector<1x16x128xf32>
    %375 = vector.shape_cast %374 : vector<1x16x128xf32> to vector<16x128xf32>
    %376 = vector.extract_strided_slice %375 {offsets = [0, 0], sizes = [4, 128], strides = [1, 1]} : vector<16x128xf32> to vector<4x128xf32>
    %377 = vector.extract_strided_slice %375 {offsets = [4, 0], sizes = [4, 128], strides = [1, 1]} : vector<16x128xf32> to vector<4x128xf32>
    %378 = vector.extract_strided_slice %375 {offsets = [8, 0], sizes = [4, 128], strides = [1, 1]} : vector<16x128xf32> to vector<4x128xf32>
    %379 = vector.extract_strided_slice %375 {offsets = [12, 0], sizes = [4, 128], strides = [1, 1]} : vector<16x128xf32> to vector<4x128xf32>
    %c1_i32_80 = arith.constant 1 : i32
    %380 = arith.cmpi sge, %372, %c1_i32_80 : i32
    %c8_i32_81 = arith.constant 8 : i32
    %381 = arith.cmpi sle, %372, %c8_i32_81 : i32
    %382 = arith.andi %380, %381 : i1
    %383 = vector.broadcast %372 : i32 to vector<1x128xi32>
    %384 = arith.cmpi eq, %0, %383 : vector<1x128xi32>
    %385 = vector.broadcast %382 : i1 to vector<1x128xi1>
    %386 = arith.andi %385, %384 : vector<1x128xi1>
    %387 = vector.shape_cast %386 : vector<1x128xi1> to vector<1x128xi1>
    %388 = vector.broadcast %387 : vector<1x128xi1> to vector<4x128xi1>
    %389 = arith.select %388, %377, %337 : vector<4x128xi1>, vector<4x128xf32>
    %390 = arith.addf %363, %377 : vector<4x128xf32>
    %cst_82 = arith.constant dense<0xFF800000> : vector<128xf32>
    %391 = vector.multi_reduction <maximumf>, %390, %cst_82 [0] : vector<4x128xf32> to vector<128xf32>
    %392 = vector.shape_cast %391 : vector<128xf32> to vector<1x128xf32>
    %393 = vector.broadcast %392 : vector<1x128xf32> to vector<4x128xf32>
    %394 = arith.subf %390, %393 : vector<4x128xf32>
    %395 = math.exp %394 : vector<4x128xf32>
    %cst_83 = arith.constant dense<0.000000e+00> : vector<128xf32>
    %396 = vector.multi_reduction <add>, %395, %cst_83 [0] : vector<4x128xf32> to vector<128xf32>
    %397 = vector.shape_cast %396 : vector<128xf32> to vector<1x128xf32>
    %398 = math.log %397 : vector<1x128xf32>
    %399 = arith.addf %392, %398 : vector<1x128xf32>
    %400 = arith.addf %363, %378 : vector<4x128xf32>
    %401 = vector.broadcast %399 : vector<1x128xf32> to vector<4x128xf32>
    %402 = arith.addf %401, %379 : vector<4x128xf32>
    %403 = arith.maximumf %400, %402 : vector<4x128xf32>
    %404 = arith.minimumf %400, %402 : vector<4x128xf32>
    %405 = arith.subf %404, %403 : vector<4x128xf32>
    %406 = math.exp %405 : vector<4x128xf32>
    %cst_84 = arith.constant 1.000000e+00 : f32
    %407 = vector.broadcast %cst_84 : f32 to vector<4x128xf32>
    %408 = arith.addf %407, %406 : vector<4x128xf32>
    %409 = math.log %408 : vector<4x128xf32>
    %410 = arith.addf %403, %409 : vector<4x128xf32>
    %411 = arith.addf %410, %376 : vector<4x128xf32>
    %c1_i32_85 = arith.constant 1 : i32
    %412 = arith.cmpi sge, %372, %c1_i32_85 : i32
    %c7_i32_86 = arith.constant 7 : i32
    %413 = arith.cmpi sle, %372, %c7_i32_86 : i32
    %414 = arith.andi %412, %413 : i1
    %415 = arith.select %414, %411, %363 : vector<4x128xf32>
    %c1_i32_87 = arith.constant 1 : i32
    %416 = arith.addi %372, %c1_i32_87 : i32
    %417 = vector.broadcast %416 : i32 to vector<1x128xi32>
    %418 = arith.cmpi eq, %0, %417 : vector<1x128xi32>
    %419 = vector.broadcast %414 : i1 to vector<1x128xi1>
    %420 = arith.andi %419, %418 : vector<1x128xi1>
    %421 = vector.shape_cast %420 : vector<1x128xi1> to vector<1x128xi1>
    %422 = vector.broadcast %421 : vector<1x128xi1> to vector<4x128xi1>
    %423 = arith.select %422, %411, %371 : vector<4x128xi1>, vector<4x128xf32>
    %c8_i32_88 = arith.constant 8 : i32
    %424 = arith.addi %4, %c8_i32_88 : i32
    %425 = arith.index_cast %c8_i32_88 : i32 to index
    %c0_89 = arith.constant 0 : index
    %c0_90 = arith.constant 0 : index
    %426 = vector.load %arg3[%425, %c0_89, %c0_90] : memref<9x16x128xf32, #tpu.memory_space<vmem>>, vector<1x16x128xf32>
    %427 = vector.shape_cast %426 : vector<1x16x128xf32> to vector<16x128xf32>
    %428 = vector.extract_strided_slice %427 {offsets = [0, 0], sizes = [4, 128], strides = [1, 1]} : vector<16x128xf32> to vector<4x128xf32>
    %429 = vector.extract_strided_slice %427 {offsets = [4, 0], sizes = [4, 128], strides = [1, 1]} : vector<16x128xf32> to vector<4x128xf32>
    %430 = vector.extract_strided_slice %427 {offsets = [8, 0], sizes = [4, 128], strides = [1, 1]} : vector<16x128xf32> to vector<4x128xf32>
    %431 = vector.extract_strided_slice %427 {offsets = [12, 0], sizes = [4, 128], strides = [1, 1]} : vector<16x128xf32> to vector<4x128xf32>
    %c1_i32_91 = arith.constant 1 : i32
    %432 = arith.cmpi sge, %424, %c1_i32_91 : i32
    %c8_i32_92 = arith.constant 8 : i32
    %433 = arith.cmpi sle, %424, %c8_i32_92 : i32
    %434 = arith.andi %432, %433 : i1
    %435 = vector.broadcast %424 : i32 to vector<1x128xi32>
    %436 = arith.cmpi eq, %0, %435 : vector<1x128xi32>
    %437 = vector.broadcast %434 : i1 to vector<1x128xi1>
    %438 = arith.andi %437, %436 : vector<1x128xi1>
    %439 = vector.shape_cast %438 : vector<1x128xi1> to vector<1x128xi1>
    %440 = vector.broadcast %439 : vector<1x128xi1> to vector<4x128xi1>
    %441 = arith.select %440, %429, %389 : vector<4x128xi1>, vector<4x128xf32>
    %442 = arith.addf %415, %429 : vector<4x128xf32>
    %cst_93 = arith.constant dense<0xFF800000> : vector<128xf32>
    %443 = vector.multi_reduction <maximumf>, %442, %cst_93 [0] : vector<4x128xf32> to vector<128xf32>
    %444 = vector.shape_cast %443 : vector<128xf32> to vector<1x128xf32>
    %445 = vector.broadcast %444 : vector<1x128xf32> to vector<4x128xf32>
    %446 = arith.subf %442, %445 : vector<4x128xf32>
    %447 = math.exp %446 : vector<4x128xf32>
    %cst_94 = arith.constant dense<0.000000e+00> : vector<128xf32>
    %448 = vector.multi_reduction <add>, %447, %cst_94 [0] : vector<4x128xf32> to vector<128xf32>
    %449 = vector.shape_cast %448 : vector<128xf32> to vector<1x128xf32>
    %450 = math.log %449 : vector<1x128xf32>
    %451 = arith.addf %444, %450 : vector<1x128xf32>
    %452 = arith.addf %415, %430 : vector<4x128xf32>
    %453 = vector.broadcast %451 : vector<1x128xf32> to vector<4x128xf32>
    %454 = arith.addf %453, %431 : vector<4x128xf32>
    %455 = arith.maximumf %452, %454 : vector<4x128xf32>
    %456 = arith.minimumf %452, %454 : vector<4x128xf32>
    %457 = arith.subf %456, %455 : vector<4x128xf32>
    %458 = math.exp %457 : vector<4x128xf32>
    %cst_95 = arith.constant 1.000000e+00 : f32
    %459 = vector.broadcast %cst_95 : f32 to vector<4x128xf32>
    %460 = arith.addf %459, %458 : vector<4x128xf32>
    %461 = math.log %460 : vector<4x128xf32>
    %462 = arith.addf %455, %461 : vector<4x128xf32>
    %463 = arith.addf %462, %428 : vector<4x128xf32>
    %c1_i32_96 = arith.constant 1 : i32
    %464 = arith.cmpi sge, %424, %c1_i32_96 : i32
    %c7_i32_97 = arith.constant 7 : i32
    %465 = arith.cmpi sle, %424, %c7_i32_97 : i32
    %466 = arith.andi %464, %465 : i1
    %467 = arith.select %466, %463, %415 : vector<4x128xf32>
    %c1_i32_98 = arith.constant 1 : i32
    %468 = arith.addi %424, %c1_i32_98 : i32
    %469 = vector.broadcast %468 : i32 to vector<1x128xi32>
    %470 = arith.cmpi eq, %0, %469 : vector<1x128xi32>
    %471 = vector.broadcast %466 : i1 to vector<1x128xi1>
    %472 = arith.andi %471, %470 : vector<1x128xi1>
    %473 = vector.shape_cast %472 : vector<1x128xi1> to vector<1x128xi1>
    %474 = vector.broadcast %473 : vector<1x128xi1> to vector<4x128xi1>
    %475 = arith.select %474, %463, %423 : vector<4x128xi1>, vector<4x128xf32>
    %c9_i32_99 = arith.constant 9 : i32
    %c0_100 = arith.constant 0 : index
    %c0_101 = arith.constant 0 : index
    %476 = vector.load %arg5[%c0_100, %c0_101] : memref<4x128xf32, #tpu.memory_space<vmem>>, vector<4x128xf32>
    tpu.vector_store %arg5[%c0_100, %c0_101], %467 {strides = array<i32>} : memref<4x128xf32, #tpu.memory_space<vmem>>, vector<4x128xf32>,
    %c0_102 = arith.constant 0 : index
    %c0_103 = arith.constant 0 : index
    %477 = vector.load %arg6[%c0_102, %c0_103] : memref<4x128xf32, #tpu.memory_space<vmem>>, vector<4x128xf32>
    tpu.vector_store %arg6[%c0_102, %c0_103], %475 {strides = array<i32>} : memref<4x128xf32, #tpu.memory_space<vmem>>, vector<4x128xf32>,
    %c0_104 = arith.constant 0 : index
    %c0_105 = arith.constant 0 : index
    %478 = vector.load %arg7[%c0_104, %c0_105] : memref<4x128xf32, #tpu.memory_space<vmem>>, vector<4x128xf32>
    tpu.vector_store %arg7[%c0_104, %c0_105], %441 {strides = array<i32>} : memref<4x128xf32, #tpu.memory_space<vmem>>, vector<4x128xf32>,
    %c0_i32_106 = arith.constant 0 : i32
    %479 = arith.cmpi eq, %arg1, %c0_i32_106 : i32
    %480 = arith.extui %479 : i1 to i32
    %c0_i32_107 = arith.constant 0 : i32
    %481 = arith.cmpi ne, %480, %c0_i32_107 : i32
    scf.if %481 {
      %c0_108 = arith.constant 0 : index
      %c0_109 = arith.constant 0 : index
      %482 = vector.load %arg6[%c0_108, %c0_109] : memref<4x128xf32, #tpu.memory_space<vmem>>, vector<4x128xf32>
      %c0_110 = arith.constant 0 : index
      %c0_111 = arith.constant 0 : index
      %483 = vector.load %arg7[%c0_110, %c0_111] : memref<4x128xf32, #tpu.memory_space<vmem>>, vector<4x128xf32>
      %484 = arith.addf %482, %483 : vector<4x128xf32>
      %cst_112 = arith.constant dense<0xFF800000> : vector<128xf32>
      %485 = vector.multi_reduction <maximumf>, %484, %cst_112 [0] : vector<4x128xf32> to vector<128xf32>
      %486 = vector.shape_cast %485 : vector<128xf32> to vector<1x128xf32>
      %487 = vector.broadcast %486 : vector<1x128xf32> to vector<4x128xf32>
      %488 = arith.subf %484, %487 : vector<4x128xf32>
      %489 = math.exp %488 : vector<4x128xf32>
      %cst_113 = arith.constant dense<0.000000e+00> : vector<128xf32>
      %490 = vector.multi_reduction <add>, %489, %cst_113 [0] : vector<4x128xf32> to vector<128xf32>
      %491 = vector.shape_cast %490 : vector<128xf32> to vector<1x128xf32>
      %492 = math.log %491 : vector<1x128xf32>
      %493 = arith.addf %486, %492 : vector<1x128xf32>
      %c0_114 = arith.constant 0 : index
      %c0_115 = arith.constant 0 : index
      %494 = vector.load %arg4[%c0_114, %c0_115] : memref<1x128xf32, #tpu.memory_space<vmem>>, vector<1x128xf32>
      tpu.vector_store %arg4[%c0_114, %c0_115], %493 {strides = array<i32>} : memref<1x128xf32, #tpu.memory_space<vmem>>, vector<1x128xf32>,
    } else {
    }
    return
  }
  func.func @transform_0(%arg0: i32, %arg1: i32) -> (i32, i32) {
    %c0_i32 = arith.constant 0 : i32
    %c0_i32_0 = arith.constant 0 : i32
    return %c0_i32, %arg0 : i32, i32
  }
  func.func @transform_1(%arg0: i32, %arg1: i32) -> (i32, i32, i32) {
    %c0_i32 = arith.constant 0 : i32
    %c0_i32_0 = arith.constant 0 : i32
    return %arg1, %c0_i32, %arg0 : i32, i32, i32
  }
  func.func @transform_2(%arg0: i32, %arg1: i32) -> (i32, i32) {
    %c0_i32 = arith.constant 0 : i32
    %c0_i32_0 = arith.constant 0 : i32
    return %c0_i32, %arg0 : i32, i32
  }
}

</mosaic_0001>

<bundles_post_ra>
// kernel: tile.7
= control target key start
LH: loop header
LB: loop body
LE: loop exit
PB: predicated region body
PF: predicated region fallthrough
CT: control target
= control target key end

     0   :  { %s548_s0 = inlined_call_operand.vmem [shape: f32[4,6,1152], index: 0, kind: input, shape index: {}]   ;;  %s549_s1 = inlined_call_operand.vmem [shape: f32[24,1152], index: 1, kind: output, shape index: {}]  }
   0x1   :  { %v2_v0 = vld [vmem:[%s548_s0] sm:$0x3f]   ;;  %v180_v1 = vld [vmem:[%s548_s0 + $0x8] sm:$0x3f]   ;;  %v182_v2 = vld [vmem:[%s548_s0 + $0x10] sm:$0x3f]  }
   0x2   :  { %3 = vst [vmem:[%s549_s1] sm:$0x3f] %v2_v0   ;;  %181 = vst [vmem:[%s549_s1 + $0x8] sm:$0x3f] %v180_v1   ;;  %v184_v3 = vld [vmem:[%s548_s0 + $0x18] sm:$0x3f]  }
   0x3   :  { %183 = vst [vmem:[%s549_s1 + $0x10] sm:$0x3f] %v182_v2   ;;  %v186_v4 = vld [vmem:[%s548_s0 + $0x20] sm:$0x3f]   ;;  %v188_v5 = vld [vmem:[%s548_s0 + $0x28] sm:$0x3f]  }
   0x4   :  { %185 = vst [vmem:[%s549_s1 + $0x18] sm:$0x3f] %v184_v3   ;;  %187 = vst [vmem:[%s549_s1 + $0x20] sm:$0x3f] %v186_v4   ;;  %v190_v6 = vld [vmem:[%s548_s0 + $0x30] sm:$0x3f]  }
   0x5   :  { %189 = vst [vmem:[%s549_s1 + $0x28] sm:$0x3f] %v188_v5   ;;  %v192_v7 = vld [vmem:[%s548_s0 + $0x38] sm:$0x3f]   ;;  %v194_v8 = vld [vmem:[%s548_s0 + $0x40] sm:$0x3f]  }
   0x6   :  { %191 = vst [vmem:[%s549_s1 + $0x30] sm:$0x3f] %v190_v6   ;;  %193 = vst [vmem:[%s549_s1 + $0x38] sm:$0x3f] %v192_v7   ;;  %v196_v9 = vld [vmem:[%s548_s0 + $0x48] sm:$0x3f]  }
   0x7   :  { %195 = vst [vmem:[%s549_s1 + $0x40] sm:$0x3f] %v194_v8   ;;  %v199_v10 = vld [vmem:[%s548_s0 + $0x50] sm:$0x3f]   ;;  %v202_v11 = vld [vmem:[%s548_s0 + $0x58] sm:$0x3f]  }
   0x8   :  { %197 = vst [vmem:[%s549_s1 + $0x6] sm:$0x3] %v196_v9   ;;  %198 = vst [vmem:[%s549_s1 + $0x46] sm:$0x3c] %v196_v9   ;;  %v205_v12 = vld [vmem:[%s548_s0 + $0x60] sm:$0x3f]  }
   0x9   :  { %200 = vst [vmem:[%s549_s1 + $0xe] sm:$0x3] %v199_v10   ;;  %201 = vst [vmem:[%s549_s1 + $0x4e] sm:$0x3c] %v199_v10   ;;  %v208_v13 = vld [vmem:[%s548_s0 + $0x68] sm:$0x3f]  }
   0xa   :  { %203 = vst [vmem:[%s549_s1 + $0x16] sm:$0x3] %v202_v11   ;;  %204 = vst [vmem:[%s549_s1 + $0x56] sm:$0x3c] %v202_v11   ;;  %v211_v14 = vld [vmem:[%s548_s0 + $0x70] sm:$0x3f]  }
   0xb   :  { %206 = vst [vmem:[%s549_s1 + $0x1e] sm:$0x3] %v205_v12   ;;  %207 = vst [vmem:[%s549_s1 + $0x5e] sm:$0x3c] %v205_v12   ;;  %v214_v15 = vld [vmem:[%s548_s0 + $0x78] sm:$0x3f]  }
   0xc   :  { %209 = vst [vmem:[%s549_s1 + $0x26] sm:$0x3] %v208_v13   ;;  %210 = vst [vmem:[%s549_s1 + $0x66] sm:$0x3c] %v208_v13   ;;  %v217_v16 = vld [vmem:[%s548_s0 + $0x80] sm:$0x3f]  }
   0xd   :  { %212 = vst [vmem:[%s549_s1 + $0x2e] sm:$0x3] %v211_v14   ;;  %213 = vst [vmem:[%s549_s1 + $0x6e] sm:$0x3c] %v211_v14   ;;  %v220_v17 = vld [vmem:[%s548_s0 + $0x88] sm:$0x3f]  }
   0xe   :  { %215 = vst [vmem:[%s549_s1 + $0x36] sm:$0x3] %v214_v15   ;;  %216 = vst [vmem:[%s549_s1 + $0x76] sm:$0x3c] %v214_v15   ;;  %v223_v18 = vld [vmem:[%s548_s0 + $0x90] sm:$0x3f]  }
   0xf   :  { %218 = vst [vmem:[%s549_s1 + $0x3e] sm:$0x3] %v217_v16   ;;  %219 = vst [vmem:[%s549_s1 + $0x7e] sm:$0x3c] %v217_v16   ;;  %v226_v19 = vld [vmem:[%s548_s0 + $0x98] sm:$0x3f]  }
  0x10   :  { %221 = vst [vmem:[%s549_s1 + $0x46] sm:$0x3] %v220_v17   ;;  %222 = vst [vmem:[%s549_s1 + $0x86] sm:$0x3c] %v220_v17   ;;  %v229_v20 = vld [vmem:[%s548_s0 + $0xa0] sm:$0x3f]  }
  0x11   :  { %224 = vst [vmem:[%s549_s1 + $0x4c] sm:$0xf] %v223_v18   ;;  %225 = vst [vmem:[%s549_s1 + $0x8c] sm:$0x30] %v223_v18   ;;  %v232_v21 = vld [vmem:[%s548_s0 + $0xa8] sm:$0x3f]  }
  0x12   :  { %227 = vst [vmem:[%s549_s1 + $0x54] sm:$0xf] %v226_v19   ;;  %228 = vst [vmem:[%s549_s1 + $0x94] sm:$0x30] %v226_v19   ;;  %v235_v22 = vld [vmem:[%s548_s0 + $0xb0] sm:$0x3f]  }
  0x13   :  { %230 = vst [vmem:[%s549_s1 + $0x5c] sm:$0xf] %v229_v20   ;;  %231 = vst [vmem:[%s549_s1 + $0x9c] sm:$0x30] %v229_v20   ;;  %v238_v23 = vld [vmem:[%s548_s0 + $0xb8] sm:$0x3f]  }
  0x14   :  { %233 = vst [vmem:[%s549_s1 + $0x64] sm:$0xf] %v232_v21   ;;  %234 = vst [vmem:[%s549_s1 + $0xa4] sm:$0x30] %v232_v21   ;;  %v241_v24 = vld [vmem:[%s548_s0 + $0xc0] sm:$0x3f]  }
  0x15   :  { %236 = vst [vmem:[%s549_s1 + $0x6c] sm:$0xf] %v235_v22   ;;  %237 = vst [vmem:[%s549_s1 + $0xac] sm:$0x30] %v235_v22   ;;  %v244_v25 = vld [vmem:[%s548_s0 + $0xc8] sm:$0x3f]  }
  0x16   :  { %239 = vst [vmem:[%s549_s1 + $0x74] sm:$0xf] %v238_v23   ;;  %240 = vst [vmem:[%s549_s1 + $0xb4] sm:$0x30] %v238_v23   ;;  %v247_v26 = vld [vmem:[%s548_s0 + $0xd0] sm:$0x3f]  }
  0x17   :  { %242 = vst [vmem:[%s549_s1 + $0x7c] sm:$0xf] %v241_v24   ;;  %243 = vst [vmem:[%s549_s1 + $0xbc] sm:$0x30] %v241_v24   ;;  %v250_v27 = vld [vmem:[%s548_s0 + $0xd8] sm:$0x3f]  }
  0x18   :  { %245 = vst [vmem:[%s549_s1 + $0x84] sm:$0xf] %v244_v25   ;;  %246 = vst [vmem:[%s549_s1 + $0xc4] sm:$0x30] %v244_v25   ;;  %v252_v28 = vld [vmem:[%s548_s0 + $0xe0] sm:$0x3f]  }
  0x19   :  { %248 = vst [vmem:[%s549_s1 + $0x8c] sm:$0xf] %v247_v26   ;;  %249 = vst [vmem:[%s549_s1 + $0xcc] sm:$0x30] %v247_v26   ;;  %v254_v29 = vld [vmem:[%s548_s0 + $0xe8] sm:$0x3f]  }
  0x1a   :  { %251 = vst [vmem:[%s549_s1 + $0x92] sm:$0x3f] %v250_v27   ;;  %253 = vst [vmem:[%s549_s1 + $0x9a] sm:$0x3f] %v252_v28   ;;  %v256_v30 = vld [vmem:[%s548_s0 + $0xf0] sm:$0x3f]  }
  0x1b   :  { %255 = vst [vmem:[%s549_s1 + $0xa2] sm:$0x3f] %v254_v29   ;;  %v258_v31 = vld [vmem:[%s548_s0 + $0xf8] sm:$0x3f]   ;;  %v260_v32 = vld [vmem:[%s548_s0 + $0x100] sm:$0x3f]  }
  0x1c   :  { %257 = vst [vmem:[%s549_s1 + $0xaa] sm:$0x3f] %v256_v30   ;;  %259 = vst [vmem:[%s549_s1 + $0xb2] sm:$0x3f] %v258_v31   ;;  %v262_v33 = vld [vmem:[%s548_s0 + $0x108] sm:$0x3f]  }
  0x1d   :  { %261 = vst [vmem:[%s549_s1 + $0xba] sm:$0x3f] %v260_v32   ;;  %v264_v34 = vld [vmem:[%s548_s0 + $0x110] sm:$0x3f]   ;;  %v266_v35 = vld [vmem:[%s548_s0 + $0x118] sm:$0x3f]  }
  0x1e   :  { %263 = vst [vmem:[%s549_s1 + $0xc2] sm:$0x3f] %v262_v33   ;;  %265 = vst [vmem:[%s549_s1 + $0xca] sm:$0x3f] %v264_v34  }
  0x1f   :  { %267 = vst [vmem:[%s549_s1 + $0xd2] sm:$0x3f] %v266_v35  }

// kernel: hmm_net_forward.2
= control target key start
LH: loop header
LB: loop body
LE: loop exit
PB: predicated region body
PF: predicated region fallthrough
CT: control target
= control target key end

     0   :  { %s1104_s24 = smov 0   ;;  %s1106_s25 = smov 0   ;;  %s1262_s0 = inlined_call_operand.vmem [shape: f32[16,1152], index: 0, kind: input, shape index: {}]   ;;  %s1263_s1 = inlined_call_operand.vmem [shape: f32[24,1152], index: 1, kind: input, shape index: {}]   ;;  %s1264_s2 = inlined_call_operand.vmem [shape: bf16[32,16], index: 2, kind: input, shape index: {}]   ;;  %s1265_s3 = inlined_call_operand.vmem [shape: f32[32,1], index: 3, kind: input, shape index: {}]   ;;  %s1266_s4 = inlined_call_operand.vmem [shape: bf16[36,32], index: 4, kind: input, shape index: {}]   ;;  %s1267_s5 = inlined_call_operand.vmem [shape: f32[36,1], index: 5, kind: input, shape index: {}]   ;;  %s1268_s6 = inlined_call_operand.vmem [shape: f32[4,24], index: 6, kind: input, shape index: {}]   ;;  %s1269_s7 = inlined_call_operand.vmem [shape: f32[9,16,128], index: 7, kind: output, shape index: {}]  }
   0x1   :  { %s1108_s26 = smov 0  }
   0x2 LB: > { %s894_s27 = sadd.s32 4294967295, %s1059_s26   ;;  %s1121_s28 = sadd.s32 1, %s1059_s26   ;;  %s1059_s26 = sphi %s1108_s26, %s1273_s26   ;;  %s1055_s25 = sphi %s1106_s25, %s1272_s25   ;;  %s1051_s24 = sphi %s1104_s24, %s1271_s24  }
   0x3   : > { %s21_s29 = ssub.s32 %s1059_s26, %s1121_s28  ;;  %s24_s30 = sadd.s32 1, %s1055_s25 }
   0x4   : > { %p22_p0 = scmp.eq.s32.totalorder %s21_s29, 0  ;;  %p31_p1 = scmp.ne.s32.totalorder %s1055_s25, %s1051_s24 }
   0x5   : > { %p32_p2 = scmp.eq.s32.totalorder %s1059_s26, 0  ;;  %p897_p4 = scmp.ge.s32.totalorder %s1059_s26, 9 }
   0x6   : > { %s1130_s8 = scalar_select %p22_p0, %s1055_s25, %s24_s30  }
   0x7   : > { %p1132_p3 = por %p32_p2, %p31_p1  ;;  %229 = sbr.rel (%p897_p4) target bundleno = 23 (0x17), region = 36 }
   0xc   : > { %232 = sbr.rel (!%p1132_p3) target bundleno = 17 (0x11), region = 40  ;;  %s234_s10 = sand.u32 (%p1132_p3), 1, %s1055_s25  }
   0xd   : > { %s899_s11 = sshll.u32 (%p1132_p3), %s1059_s26, 3  ;;  %s898_s12 = sshll.u32 (%p1132_p3), %s234_s10, 4 }
   0xe   : > { %s238_s15 = scalar_lea.vmem (%p1132_p3), %s1262_s0, %s899_s11  ;;  %s236_s16 = scalar_lea.vmem (%p1132_p3), [#allocation2], %s898_s12 }
   0xf   : > { %v269_v0 = vld [vmem:[%s238_s15] sm:$0xff] (%p1132_p3)  ;;  %v271_v1 = vld [vmem:[%s238_s15 + $0x48] sm:$0xff] (%p1132_p3) }
  0x10   : > { %270 = vst [vmem:[%s236_s16] sm:$0xff] (%p1132_p3), %v269_v0  ;;  %272 = vst [vmem:[%s236_s16 + $0x8] sm:$0xff] (%p1132_p3), %v271_v1 }
  0x11 PF: > { %278 = sbr.rel (!%p1132_p3) target bundleno = 23 (0x17), region = 78  ;;  %s280_s17 = sand.u32 (%p1132_p3), 1, %s1055_s25  }
  0x12   : > { %s900_s18 = sshll.u32 (%p1132_p3), %s1059_s26, 3  ;;  %s977_s19 = smul.u32 (%p1132_p3), 24, %s280_s17 }
  0x13   : > { %s284_s22 = scalar_lea.vmem (%p1132_p3), %s1263_s1, %s900_s18 }
  0x14   : > { %v317_v2 = vld [vmem:[%s284_s22] sm:$0xff] (%p1132_p3)  ;;  %v319_v3 = vld [vmem:[%s284_s22 + $0x48] sm:$0xff] (%p1132_p3)  ;;  %v321_v4 = vld [vmem:[%s284_s22 + $0x90] sm:$0xff] (%p1132_p3)  ;;  %s282_s23 = scalar_lea.vmem (%p1132_p3), [#allocation3], %s977_s19 }
  0x15   : > { %318 = vst [vmem:[%s282_s23] sm:$0xff] (%p1132_p3), %v317_v2  ;;  %320 = vst [vmem:[%s282_s23 + $0x8] sm:$0xff] (%p1132_p3), %v319_v3 }
  0x16   : > { %322 = vst [vmem:[%s282_s23 + $0x10] sm:$0xff] %v321_v4 }
  0x17 PF: > { %p901_p5 = scmp.ge.s32.totalorder %s1059_s26, 1  ;;  %p327_p6 = scmp.lt.s32.totalorder %s1059_s26, 10 }
  0x19   : > { %p328_p7 = pnand %p901_p5, %p327_p6 }
  0x1a   : > { %s334_s29 = sand.u32 (!%p328_p7), 1, %s1051_s24   ;;  %p376_p8 = scmp.lt.s32.totalorder (!%p328_p7), %s894_s27, 8 }
  0x1b   : > { %331 = sbr.rel (%p328_p7) target bundleno = 716 (0x2cc), region = 116  ;;  %s902_s10 = sshll.u32 (!%p328_p7), %s334_s29, 4 }
  0x1c   : > { %s336_s13 = scalar_lea.vmem (!%p328_p7), [#allocation2], %s902_s10  ;;  %s978_s22 = smul.u32 (!%p328_p7), 24, %s334_s29 }
  0x1e   : > { %s343_s23 = scalar_lea.vmem (!%p328_p7), [#allocation3], %s978_s22 }
  0x20   : > { %v1008_v5 = vld [vmem:[%s1264_s2] sm:$0xff]   ;;  %vm423_vm0 = vcmask 130048   ;;  %v391_v6 = vld [vmem:[%s1265_s3 + $0x10] sm:$0xff]  ;;  %v387_v8 = vld [vmem:[%s336_s13 + $0x8] sm:$0xff]  ;;  %v1061_v9 = vmov 0   ;;  %v1062_v20 = vmov 0.0  }
  0x21   : > { %939 = vmatprep.mubr.msk.bf16.mxu0 %vm423_vm0, %v1008_v5  ;;  %v386_v7 = vld [vmem:[%s336_s13] sm:$0xff]  ;;  %1006 = vset.pattern.permute.xlu0 %v1061_v9  ;;  %v1009_v12 = vld [vmem:[%s1264_s2 + $0x8] sm:$0xff]   ;;  %v392_v13 = vld [vmem:[%s1265_s3 + $0x18] sm:$0xff]  ;;  %vm1063_vm1 = vmmov 0   ;;  %vm533_vm2 = vcmask 261120   ;;  %vm606_vm3 = vcmask 195584  }
  0x22   : > { %1007 = vset.pattern.permute.xlu1 %v1061_v9  ;;  %v388_v10 = vpack.c.bf16 %v387_v8, %v386_v7  ;;  %405 = vperm.xlu0 %1006, %v391_v6   ;;  %v389_v11 = vld [vmem:[%s1265_s3] sm:$0xff]  ;;  %v390_v14 = vld [vmem:[%s1265_s3 + $0x8] sm:$0xff]  ;;  %v492_v17 = vld [vmem:[%s1267_s5 + $0x10] sm:$0xff]  ;;  %vm783_vm4 = vcmask 1043456   ;;  %s1275_s27 = smov (!%p376_p8, %s894_s27), 8 }
  0x23   : > { %395 = vperm.xlu1 %1007, %v389_v11   ;;  %v490_v15 = vld [vmem:[%s1267_s5] sm:$0xff]  ;;  %v491_v16 = vld [vmem:[%s1267_s5 + $0x8] sm:$0xff]  ;;  %v493_v19 = vld [vmem:[%s1267_s5 + $0x18] sm:$0xff]  ;;  %943 = vmatprep.subr.bf16.mxu1 %v1062_v20  ;;  %s920_s30 = sshll.u32 %s1275_s27, 4 }
  0x24   : > { %937 = vmatprep.subr.bf16.mxu0 %v388_v10  ;;  %v494_v18 = vld [vmem:[%s1267_s5 + $0x20] sm:$0xf]  ;;  %947 = vmatprep.mubr.msk.bf16.mxu1 %vm1063_vm1, %v1062_v20  ;;  %v1011_v40 = vld [vmem:[%s1266_s4 + $0x8] sm:$0xff]   ;;  %v1012_v41 = vld [vmem:[%s1266_s4 + $0x10] ss:$0 sps:$4 sm:$0x33]   ;;  %s380_s11 = scalar_lea.vmem %s1269_s7, %s920_s30 }
  0x25   : > { %938 = vmatpush3.bf16.msra.mxu0 %v388_v10  ;;  %v1010_v39 = vld [vmem:[%s1266_s4] sm:$0xff]   ;;  %v602_v52 = vld [vmem:[%s343_s23 + $0x10] sm:$0xff] }
  0x26   : > { %410 = vperm.xlu0 %1006, %v392_v13   ;;  %959 = vmatprep.subr.mxu0 %v1062_v20  ;;  %v601_v55 = vld [vmem:[%s343_s23 + $0x8] sm:$0xff]  ;;  %v600_v60 = vld [vmem:[%s343_s23] sm:$0xff] }
  0x27   : > { %400 = vperm.xlu1 %1007, %v390_v14   ;;  %v599_v5 = vld [vmem:[%s1268_s6] sm:$0xf] }
  0x28   : > { %940 = vmatmul.mubr.msk.bf16.vlgmr.msra.gmra.mxu0 %vm423_vm0, %v1009_v12 }
  0x29   : > { %965 = vmatprep.mubr.msk.f32.mxu0 %vm1063_vm1, %v1062_v20 }
  0x2a   : > { %497 = vperm.xlu0 %1006, %v490_v15  }
  0x2b   : > { %502 = vperm.xlu1 %1007, %v491_v16  }
  0x2e   : > { %507 = vperm.xlu0 %1006, %v492_v17  }
  0x2f   : > { %517 = vperm.xlu1 %1007, %v494_v18  }
  0x32   : > { %512 = vperm.xlu0 %1006, %v493_v19  }
  0x9d   : > { %v406_v21 = vpop.permute.xlu0 %405 }
  0x9e   : > { %v396_v22 = vpop.permute.xlu1 %395 }
  0xa1   : > { %v411_v26 = vpop.permute.xlu0 %410 }
  0xa2   : > { %v401_v29 = vpop.permute.xlu1 %400 }
  0xa5   : > { %v498_v42 = vpop.permute.xlu0 %497 }
  0xa6   : > { %v503_v45 = vpop.permute.xlu1 %502 }
  0xa9   : > { %v508_v48 = vpop.permute.xlu0 %507 }
  0xaa   : > { %v518_v6 = vpop.permute.xlu1 %517 }
  0xad   : > { %v513_v59 = vpop.permute.xlu0 %512 }
  0xe8   : > { %v941_v23 = vpop.f32.mrf.mxu0 }
  0xe9   : > { %v473_v24 = vadd.f32 %v941_v23, %v406_v21 }
  0xea   : > { %v464_v25 = vpop.f32.mrf.mxu0 }
  0xeb   : > { %1013 = vtanh.f32 %v473_v24  ;;  %v465_v31 = vadd.f32 %v464_v25, %v396_v22 }
  0xec   : > { %v942_v27 = vpop.f32.mrf.mxu0 }
  0xed   : > { %v476_v28 = vadd.f32 %v942_v27, %v411_v26 }
  0xee   : > { %v467_v30 = vpop.f32.mrf.mxu0 }
  0xef   : > { %1015 = vtanh.f32 %v476_v28  ;;  %v468_v32 = vadd.f32 %v467_v30, %v401_v29 }
  0xf1   : > { %1017 = vtanh.f32 %v468_v32 }
  0xf2   : > { %1019 = vtanh.f32 %v465_v31 }
  0xf8   : > { %v1014_v33 = vpop.eup %1013 }
  0xfc   : > { %v1016_v34 = vpop.eup %1015 }
  0xfd   : > { %v489_v35 = vpack.c.bf16 %v1016_v34, %v1014_v33 }
  0xfe   : > { %v1018_v36 = vpop.eup %1017 }
  0xff   : > { %944 = vmatpush3.bf16.msra.mxu1 %v489_v35  ;;  %v1020_v37 = vpop.eup %1019 }
 0x100   : > { %945 = vmatprep.subr.bf16.mxu1 %v1062_v20  ;;  %v488_v38 = vpack.c.bf16 %v1018_v36, %v1020_v37 }
 0x103   : > { %946 = vmatpush3.bf16.msra.mxu1 %v488_v38 }
 0x106   : > { %948 = vmatmul.mubr.msk.bf16.vlgmr.msra.gmra.mxu1 %vm533_vm2, %v1010_v39 }
 0x107   : > { %951 = vmatprep.mubr.msk.bf16.mxu1 %vm1063_vm1, %v1062_v20 }
 0x10e   : > { %952 = vmatmul.mubr.msk.bf16.gmra.mxu1 %vm533_vm2, %v1011_v40 }
 0x10f   : > { %955 = vmatprep.mubr.msk.bf16.mxu1 %vm1063_vm1, %v1062_v20 }
 0x116   : > { %956 = vmatmul.mubr.msk.bf16.gmra.mxu1 %vm533_vm2, %v1012_v41 }
 0x1c6   : > { %v577_v43 = vpop.f32.mrf.mxu1 }
 0x1c7   : > { %v578_v50 = vadd.f32 %v577_v43, %v498_v42 }
 0x1c8   : > { %v949_v44 = vpop.f32.mrf.mxu1 }
 0x1c9   : > { %v603_v2 = vmul.f32 %v600_v60, %v578_v50 }
 0x1ca   : > { %v580_v46 = vpop.f32.mrf.mxu1 }
 0x1cb   : > { %v581_v47 = vadd.f32 %v580_v46, %v503_v45 }
 0x1cc   : > { %v950_v49 = vpop.f32.mrf.mxu1 }
 0x1cd   : > { %v680_v53 = vmax.f32 %v578_v50, %v581_v47  ;;  %v604_v62 = vmul.f32 %v601_v55, %v581_v47 }
 0x1ce   : > { %v585_v51 = vpop.f32.mrf.mxu1 }
 0x1cf   : > { %v586_v54 = vadd.f32 %v585_v51, %v508_v48 }
 0x1d0   : > { %v953_v56 = vpop.f32.mrf.mxu1 }
 0x1d1   : > { %v605_v57 = vmul.f32 %v602_v52, %v586_v54  ;;  %v681_v58 = vmax.f32 %v680_v53, %v586_v54 }
 0x1d2   : > { %v588_v61 = vpop.f32.mrf.mxu1 }
 0x1d3   : > { %v682_v63 = vrot.slane %v681_v58, 4  ;;  %v1213_v0 = vadd.f32 %v588_v61, %v513_v59  ;;  %960 = vmatpush3.msra.mxu0 %v605_v57 }
 0x1d4   : > { %v954_v1 = vpop.f32.mrf.mxu1  ;;  %961 = vmatprep.subr.mxu0 %v1062_v20 }
 0x1d5   : > { %v683_v3 = vmax.f32 %v681_v58, %v682_v63  ;;  %v772_v4 = vrot.slane %v1213_v0, 4  ;;  %962 = vmatpush3.msra.mxu0 %v604_v62 }
 0x1d6   : > { %v593_v7 = vpop.f32.mrf.mxu1  ;;  %963 = vmatprep.subr.mxu0 %v1062_v20 }
 0x1d7   : > { %v684_v8 = vrot.slane %v683_v3, 2  ;;  %v774_v9 = vmax.f32 %v1213_v0, %v772_v4  ;;  %v775_v10 = vmin.f32 %v1213_v0, %v772_v4  ;;  %v1223_v11 = vadd.f32 %v593_v7, %v518_v6  ;;  %964 = vmatpush3.msra.mxu0 %v603_v2 }
 0x1d8   : > { %966 = vmatmul.mubr.msk.f32.vlgmr.msra.gmra.mxu0 %vm606_vm3, %v599_v5  ;;  %968 = vmatprep.subr.mxu0 %v1062_v20  ;;  %v957_v12 = vpop.f32.mrf.mxu1 }
 0x1d9   : > { %v685_v13 = vmax.f32 %v683_v3, %v684_v8  ;;  %v776_v14 = vsub.f32 %v775_v10, %v774_v9  ;;  %v784_v15 = vsel %vm783_vm4, %v1223_v11, -inf  ;;  %974 = vmatprep.mubr.msk.f32.mxu0 %vm1063_vm1, %v1062_v20 }
 0x1da   : > { %v785_v16 = vrot.slane %v784_v15, 4  ;;  %v596_v17 = vpop.f32.mrf.mxu1 }
 0x1db   : > { %v686_v18 = vrot.slane %v685_v13, 1  ;;  %v777_v19 = vmul.f32 1.442695, %v776_v14 }
 0x1dc   : > { %v786_v21 = vmax.f32 %v784_v15, %v785_v16  ;;  %v958_v22 = vpop.f32.mrf.mxu1 }
 0x1dd   : > { %v1231_v23 = vmax.f32 %v685_v13, %v686_v18  ;;  %1021 = vpow2.f32 %v777_v19 }
 0x1de   : > { %v787_v24 = vrot.slane %v786_v21, 2 }
 0x1df   : > { %v689_v25 = vsub.f32 %v581_v47, %v1231_v23  ;;  %v690_v26 = vsub.f32 %v586_v54, %v1231_v23  ;;  %v688_v28 = vsub.f32 %v578_v50, %v1231_v23 }
 0x1e0   : > { %v788_v27 = vmax.f32 %v786_v21, %v787_v24 }
 0x1e1   : > { %v695_v29 = vmul.f32 1.442695, %v690_v26  ;;  %v693_v31 = vmul.f32 1.442695, %v689_v25  ;;  %v691_v33 = vmul.f32 1.442695, %v688_v28 }
 0x1e2   : > { %v789_v30 = vrot.slane %v788_v27, 1 }
 0x1e3   : > { %1023 = vpow2.f32 %v695_v29 }
 0x1e4   : > { %v790_v32 = vmax.f32 %v788_v27, %v789_v30  ;;  %1025 = vpow2.f32 %v693_v31 }
 0x1e5   : > { %1027 = vpow2.f32 %v691_v33 }
 0x1e6   : > { %v791_v34 = vsub.f32 %v1223_v11, %v790_v32 }
 0x1e8   : > { %v792_v35 = vmul.f32 1.442695, %v791_v34 }
 0x1ea   : > { %v1022_v36 = vpop.eup %1021  ;;  %1029 = vpow2.f32 %v792_v35 }
 0x1eb   : > { %v779_v37 = vadd.f32 1.0, %v1022_v36 }
 0x1ed   : > { %1031 = vlog2.f32 %v779_v37 }
 0x1f0   : > { %v1024_v38 = vpop.eup %1023 }
 0x1f1   : > { %969 = vmatpush3.msra.mxu0 %v1024_v38  ;;  %v1026_v39 = vpop.eup %1025 }
 0x1f2   : > { %970 = vmatprep.subr.mxu0 %v1062_v20  ;;  %v1028_v40 = vpop.eup %1027 }
 0x1f3   : > { %971 = vmatpush3.msra.mxu0 %v1026_v39 }
 0x1f4   : > { %972 = vmatprep.subr.mxu0 %v1062_v20 }
 0x1f5   : > { %973 = vmatpush3.msra.mxu0 %v1028_v40 }
 0x1f6   : > { %975 = vmatmul.mubr.msk.f32.vlgmr.msra.gmra.mxu0 %vm606_vm3, %v599_v5 }
 0x1f7   : > { %v1030_v41 = vpop.eup %1029 }
 0x1f8   : > { %v794_v42 = vsel %vm783_vm4, %v1030_v41, 0.0 }
 0x1f9   : > { %v795_v43 = vrot.slane %v794_v42, 4 }
 0x1fa   : > { %v1032_v44 = vpop.eup %1031 }
 0x1fb   : > { %v781_v45 = vmul.f32 0.6931472, %v1032_v44  ;;  %v796_v46 = vadd.f32 %v795_v43, %v794_v42 }
 0x1fd   : > { %v782_v47 = vadd.f32 %v781_v45, %v774_v9  ;;  %v797_v48 = vrot.slane %v796_v46, 2 }
 0x1ff   : > { %v807_v20 = vsub.f32 %v1213_v0, %v782_v47  ;;  %v810_v49 = vrot.slane %v782_v47, 4  ;;  %v798_v50 = vadd.f32 %v797_v48, %v796_v46 }
 0x201   : > { %v812_v51 = vsub.f32 %v1213_v0, %v810_v49  ;;  %v799_v52 = vrot.slane %v798_v50, 1  ;;  %808 = vst [vmem:[%s380_s11 + $0x4] sm:$0xf] %v807_v20 }
 0x203   : > { %v800_v53 = vadd.f32 %v799_v52, %v798_v50  ;;  %813 = vst [vmem:[%s380_s11 + $0x4] sm:$0xf0] %v812_v51 }
 0x205   : > { %1033 = vlog2.f32 %v800_v53 }
 0x212   : > { %v1034_v54 = vpop.eup %1033 }
 0x213   : > { %v802_v55 = vmul.f32 0.6931472, %v1034_v54 }
 0x215   : > { %v803_v56 = vadd.f32 %v802_v55, %v790_v32 }
 0x217   : > { %v804_v57 = vsub.f32 %v1223_v11, %v803_v56 }
 0x219   : > { %v917_v58 = vadd.f32 -0.5, %v804_v57 }
 0x21b   : > { %814 = vst [vmem:[%s380_s11 + $0xc] sm:$0xf] %v917_v58 }
 0x298   : > { %v676_v59 = vpop.f32.mrf.mxu0 }
 0x29a   : > { %v967_v60 = vpop.f32.mrf.mxu0 }
 0x2b6   : > { %v763_v61 = vpop.f32.mrf.mxu0 }
 0x2b7   : > { %1035 = vlog2.f32 %v763_v61 }
 0x2b8   : > { %v976_v62 = vpop.f32.mrf.mxu0 }
 0x2c4   : > { %v1036_v63 = vpop.eup %1035 }
 0x2c5   : > { %v768_v1 = vmul.f32 0.6931472, %v1036_v63 }
 0x2c7   : > { %v769_v0 = vadd.f32 %v768_v1, %v1231_v23 }
 0x2c9   : > { %v770_v2 = vsub.f32 %v676_v59, %v769_v0 }
 0x2cb   : > { %806 = vst [vmem:[%s380_s11] sm:$0xf] %v770_v2 }
 0x2cc PF: > { %p14_p9 = scmp.ge.s32.totalorder %s1121_s28, 11   ;;  %s1271_s24 = smov %s1055_s25 }
 0x2cd   : > { %s1272_s25 = smov %s1130_s8  ;;  %s1273_s26 = smov %s1121_s28 }
 0x2ce   :  { %16 = sbr.rel (!%p14_p9) target bundleno = 2 (0x2), region = 167 }

// kernel: hmm_net_forward.3
= control target key start
LH: loop header
LB: loop body
LE: loop exit
PB: predicated region body
PF: predicated region fallthrough
CT: control target
= control target key end

     0   :  { %v25_v0 = vlaneseq  ;;  %v845_v6 = vmov 0   ;;  %vm63_vm2 = vcmask 1043456   ;;  %s1099_s1 = inlined_call_operand.vmem [shape: f32[9,16,128], index: 1, kind: input, shape index: {}]   ;;  %s1100_s0 = inlined_call_operand.vmem [shape: s32[1,128], index: 0, kind: input, shape index: {}]   ;;  %s1101_s2 = inlined_call_operand.vmem [shape: f32[1,128], index: 2, kind: output, shape index: {}]  }
   0x1   :  { %v865_v1 = vld [vmem:[%s1099_s1] sm:$0xff]  ;;  %v870_v2 = vld [vmem:[%s1099_s1 + $0x8] sm:$0xff]  ;;  %v887_v11 = vld [vmem:[%s1099_s1 + $0x10] sm:$0xff] }
   0x2   :  { %v875_v3 = vld [vmem:[%s1100_s0] sm:$0x1]  ;;  %v19_v4 = vrot.slane %v865_v1, 4  ;;  %v26_v5 = vshrl.u32 %v25_v0, 7  ;;  %v136_v14 = vrot.slane %v887_v11, 4  ;;  %v752_v57 = vld [vmem:[%s1099_s1 + $0x18] sm:$0xff] }
   0x3   :  { %vm23_vm0 = vcmp.eq.s32.totalorder %v875_v3, 1  ;;  %vm183_vm3 = vcmp.eq.s32.totalorder %v875_v3, 2  ;;  %vm258_vm6 = vcmp.eq.s32.totalorder %v875_v3, 3  ;;  %vm333_vm8 = vcmp.eq.s32.totalorder %v875_v3, 4 }
   0x4   :  { %v24_v7 = vsel %vm23_vm0, 1, %v845_v6  ;;  %v21_v8 = vadd.f32 %v19_v4, %v870_v2  ;;  %v881_v9 = vsub.s32 0, %v26_v5  ;;  %vm408_vm10 = vcmp.eq.s32.totalorder %v875_v3, 5 }
   0x5   :  { %vm483_vm12 = vcmp.eq.s32.totalorder %v875_v3, 6  ;;  %vm558_vm14 = vcmp.eq.s32.totalorder %v875_v3, 7  ;;  %vm633_vm0 = vcmp.eq.s32.totalorder %v875_v3, 8 }
   0x6   :  { %22 = vst [vmem:[#allocation2 - $0x4] sm:$0xf0] %v21_v8  ;;  %v28_v10 = vrot.slane %v24_v7, %v881_v9 }
   0x8   :  { %vm889_vm1 = vcmp.eq.s32.totalorder %v28_v10, 1 }
   0x9   :  { %v30_v13 = vsel %vm889_vm1, %v21_v8, -inf }
   0xa   :  { %31 = vst [vmem:[#allocation3 - $0x4] sm:$0xf0] %v30_v13 }
   0xd   :  { %v34_v15 = vld [vmem:[#allocation2] sm:$0xf] }
   0xe   :  { %v138_v16 = vadd.f32 %v136_v14, %v34_v15  ;;  %v62_v17 = vadd.f32 %v34_v15, %v19_v4  ;;  %v159_v61 = vadd.f32 %v752_v57, %v34_v15  ;;  %v84_v63 = vadd.f32 %v34_v15, %v870_v2 }
  0x10   :  { %v139_v18 = vsel %vm63_vm2, %v138_v16, -inf  ;;  %v64_v19 = vsel %vm63_vm2, %v62_v17, -inf }
  0x11   :  { %v140_v20 = vrot.slane %v139_v18, 4  ;;  %v65_v21 = vrot.slane %v64_v19, 4 }
  0x13   :  { %v141_v22 = vmax.f32 %v139_v18, %v140_v20  ;;  %v66_v23 = vmax.f32 %v64_v19, %v65_v21  ;;  %v910_v21 = vld [vmem:[%s1099_s1 + $0x20] sm:$0xff] }
  0x15   :  { %v142_v24 = vrot.slane %v141_v22, 2  ;;  %v67_v25 = vrot.slane %v66_v23, 2 }
  0x17   :  { %v143_v26 = vmax.f32 %v141_v22, %v142_v24  ;;  %v68_v27 = vmax.f32 %v66_v23, %v67_v25  ;;  %v914_v24 = vrot.slane %v845_v6, %v881_v9 }
  0x19   :  { %v144_v28 = vrot.slane %v143_v26, 1  ;;  %v69_v29 = vrot.slane %v68_v27, 1  ;;  %vm54_vm4 = vcmp.eq.s32.totalorder %v914_v24, 1 }
  0x1b   :  { %v145_v30 = vmax.f32 %v143_v26, %v144_v28  ;;  %v70_v31 = vmax.f32 %v68_v27, %v69_v29  ;;  %v211_v28 = vrot.slane %v910_v21, 4 }
  0x1d   :  { %v146_v32 = vsub.f32 %v138_v16, %v145_v30  ;;  %v71_v33 = vsub.f32 %v62_v17, %v70_v31 }
  0x1f   :  { %v147_v34 = vmul.f32 1.442695, %v146_v32  ;;  %v72_v35 = vmul.f32 1.442695, %v71_v33 }
  0x21   :  { %769 = vpow2.f32 %v147_v34 }
  0x22   :  { %771 = vpow2.f32 %v72_v35 }
  0x2e   :  { %v770_v36 = vpop.eup %769 }
  0x2f   :  { %v772_v37 = vpop.eup %771  ;;  %v149_v38 = vsel %vm63_vm2, %v770_v36, 0.0 }
  0x30   :  { %v150_v39 = vrot.slane %v149_v38, 4  ;;  %v74_v40 = vsel %vm63_vm2, %v772_v37, 0.0 }
  0x31   :  { %v75_v41 = vrot.slane %v74_v40, 4 }
  0x32   :  { %v151_v42 = vadd.f32 %v150_v39, %v149_v38 }
  0x33   :  { %v76_v43 = vadd.f32 %v75_v41, %v74_v40 }
  0x34   :  { %v152_v44 = vrot.slane %v151_v42, 2 }
  0x35   :  { %v77_v45 = vrot.slane %v76_v43, 2 }
  0x36   :  { %v153_v46 = vadd.f32 %v152_v44, %v151_v42 }
  0x37   :  { %v78_v47 = vadd.f32 %v77_v45, %v76_v43 }
  0x38   :  { %v154_v48 = vrot.slane %v153_v46, 1 }
  0x39   :  { %v79_v49 = vrot.slane %v78_v47, 1 }
  0x3a   :  { %v155_v50 = vadd.f32 %v154_v48, %v153_v46 }
  0x3b   :  { %v80_v51 = vadd.f32 %v79_v49, %v78_v47 }
  0x3c   :  { %773 = vlog2.f32 %v155_v50 }
  0x3d   :  { %775 = vlog2.f32 %v80_v51 }
  0x49   :  { %v774_v52 = vpop.eup %773 }
  0x4a   :  { %v776_v53 = vpop.eup %775  ;;  %v157_v54 = vmul.f32 0.6931472, %v774_v52 }
  0x4b   :  { %v82_v55 = vmul.f32 0.6931472, %v776_v53 }
  0x4c   :  { %v158_v56 = vadd.f32 %v157_v54, %v145_v30 }
  0x4d   :  { %v83_v58 = vadd.f32 %v82_v55, %v70_v31  ;;  %v35_v31 = vld [vmem:[#allocation3] sm:$0xf] }
  0x4e   :  { %v160_v59 = vadd.f32 %v752_v57, %v158_v56  ;;  %v754_v57 = vld [vmem:[%s1099_s1 + $0x28] sm:$0xff] }
  0x4f   :  { %v85_v60 = vadd.f32 %v83_v58, %v870_v2  ;;  %v185_v2 = vsel %vm183_vm3, 1, %v845_v6 }
  0x50   :  { %v162_v62 = vrot.slane %v160_v59, 4  ;;  %v189_v26 = vrot.slane %v185_v2, %v881_v9 }
  0x51   :  { %v87_v0 = vrot.slane %v85_v60, 4 }
  0x52   :  { %v164_v4 = vmax.f32 %v159_v61, %v162_v62  ;;  %v165_v5 = vmin.f32 %v159_v61, %v162_v62  ;;  %vm921_vm5 = vcmp.eq.s32.totalorder %v189_v26, 1 }
  0x53   :  { %v89_v7 = vmax.f32 %v84_v63, %v87_v0  ;;  %v90_v8 = vmin.f32 %v84_v63, %v87_v0 }
  0x54   :  { %v166_v10 = vsub.f32 %v165_v5, %v164_v4 }
  0x55   :  { %v91_v13 = vsub.f32 %v90_v8, %v89_v7 }
  0x56   :  { %v167_v14 = vmul.f32 1.442695, %v166_v10  ;;  %v939_v10 = vld [vmem:[%s1099_s1 + $0x30] sm:$0xff] }
  0x57   :  { %v92_v16 = vmul.f32 1.442695, %v91_v13 }
  0x58   :  { %777 = vpow2.f32 %v167_v14 }
  0x59   :  { %779 = vpow2.f32 %v92_v16 }
  0x65   :  { %v778_v17 = vpop.eup %777 }
  0x66   :  { %v780_v18 = vpop.eup %779  ;;  %v169_v19 = vadd.f32 1.0, %v778_v17  ;;  %v286_v17 = vrot.slane %v939_v10, 4 }
  0x67   :  { %v94_v20 = vadd.f32 1.0, %v780_v18 }
  0x68   :  { %781 = vlog2.f32 %v169_v19 }
  0x69   :  { %783 = vlog2.f32 %v94_v20 }
  0x75   :  { %v782_v15 = vpop.eup %781 }
  0x76   :  { %v784_v22 = vpop.eup %783  ;;  %v171_v23 = vmul.f32 0.6931472, %v782_v15 }
  0x77   :  { %v96_v25 = vmul.f32 0.6931472, %v784_v22 }
  0x78   :  { %v172_v27 = vadd.f32 %v171_v23, %v164_v4 }
  0x79   :  { %v97_v29 = vadd.f32 %v96_v25, %v89_v7  ;;  %v260_v7 = vsel %vm258_vm6, 1, %v845_v6 }
  0x7a   :  { %v173_v30 = vadd.f32 %v887_v11, %v172_v27  ;;  %v264_v13 = vrot.slane %v260_v7, %v881_v9 }
  0x7b   :  { %v98_v32 = vadd.f32 %v97_v29, %v865_v1 }
  0x7c   :  { %v213_v34 = vadd.f32 %v211_v28, %v173_v30  ;;  %v234_v59 = vadd.f32 %v754_v57, %v173_v30  ;;  %vm943_vm7 = vcmp.eq.s32.totalorder %v264_v13, 1 }
  0x7d   :  { %v116_v35 = vsel %vm54_vm4, %v98_v32, %v35_v31 }
  0x7e   :  { %v214_v36 = vsel %vm63_vm2, %v213_v34, -inf  ;;  %v191_v37 = vsel %vm921_vm5, %v173_v30, %v116_v35 }
  0x7f   :  { %v215_v38 = vrot.slane %v214_v36, 4 }
  0x81   :  { %v216_v39 = vmax.f32 %v214_v36, %v215_v38 }
  0x83   :  { %v217_v40 = vrot.slane %v216_v39, 2 }
  0x85   :  { %v218_v41 = vmax.f32 %v216_v39, %v217_v40 }
  0x87   :  { %v219_v42 = vrot.slane %v218_v41, 1 }
  0x89   :  { %v220_v43 = vmax.f32 %v218_v41, %v219_v42 }
  0x8b   :  { %v221_v44 = vsub.f32 %v213_v34, %v220_v43 }
  0x8d   :  { %v222_v45 = vmul.f32 1.442695, %v221_v44 }
  0x8f   :  { %785 = vpow2.f32 %v222_v45 }
  0x9c   :  { %v786_v46 = vpop.eup %785 }
  0x9d   :  { %v224_v47 = vsel %vm63_vm2, %v786_v46, 0.0 }
  0x9e   :  { %v225_v48 = vrot.slane %v224_v47, 4 }
  0xa0   :  { %v226_v49 = vadd.f32 %v225_v48, %v224_v47 }
  0xa2   :  { %v227_v50 = vrot.slane %v226_v49, 2 }
  0xa4   :  { %v228_v51 = vadd.f32 %v227_v50, %v226_v49 }
  0xa6   :  { %v229_v52 = vrot.slane %v228_v51, 1 }
  0xa8   :  { %v230_v53 = vadd.f32 %v229_v52, %v228_v51 }
  0xaa   :  { %787 = vlog2.f32 %v230_v53  ;;  %v335_v53 = vsel %vm333_vm8, 1, %v845_v6 }
  0xb7   :  { %v788_v54 = vpop.eup %787 }
  0xb8   :  { %v232_v55 = vmul.f32 0.6931472, %v788_v54 }
  0xba   :  { %v233_v56 = vadd.f32 %v232_v55, %v220_v43  ;;  %v756_v43 = vld [vmem:[%s1099_s1 + $0x38] sm:$0xff]  ;;  %v962_v55 = vld [vmem:[%s1099_s1 + $0x40] sm:$0xff] }
  0xbc   :  { %v235_v58 = vadd.f32 %v754_v57, %v233_v56  ;;  %v339_v56 = vrot.slane %v335_v53, %v881_v9 }
  0xbe   :  { %v237_v60 = vrot.slane %v235_v58, 4  ;;  %vm966_vm9 = vcmp.eq.s32.totalorder %v339_v56, 1 }
  0xc0   :  { %v239_v61 = vmax.f32 %v234_v59, %v237_v60  ;;  %v240_v62 = vmin.f32 %v234_v59, %v237_v60  ;;  %v361_v59 = vrot.slane %v962_v55, 4 }
  0xc2   :  { %v241_v63 = vsub.f32 %v240_v62, %v239_v61 }
  0xc4   :  { %v242_v0 = vmul.f32 1.442695, %v241_v63 }
  0xc6   :  { %789 = vpow2.f32 %v242_v0 }
  0xd3   :  { %v790_v4 = vpop.eup %789 }
  0xd4   :  { %v244_v5 = vadd.f32 1.0, %v790_v4 }
  0xd6   :  { %791 = vlog2.f32 %v244_v5 }
  0xe3   :  { %v792_v8 = vpop.eup %791 }
  0xe4   :  { %v246_v14 = vmul.f32 0.6931472, %v792_v8 }
  0xe6   :  { %v247_v16 = vadd.f32 %v246_v14, %v239_v61 }
  0xe8   :  { %v248_v19 = vadd.f32 %v910_v21, %v247_v16 }
  0xea   :  { %v288_v20 = vadd.f32 %v286_v17, %v248_v19  ;;  %v950_v2 = vsel %vm943_vm7, %v248_v19, %v191_v37  ;;  %v309_v45 = vadd.f32 %v756_v43, %v248_v19 }
  0xec   :  { %v289_v15 = vsel %vm63_vm2, %v288_v20, -inf }
  0xed   :  { %v290_v22 = vrot.slane %v289_v15, 4 }
  0xef   :  { %v291_v23 = vmax.f32 %v289_v15, %v290_v22 }
  0xf1   :  { %v292_v25 = vrot.slane %v291_v23, 2 }
  0xf3   :  { %v293_v26 = vmax.f32 %v291_v23, %v292_v25 }
  0xf5   :  { %v294_v27 = vrot.slane %v293_v26, 1 }
  0xf7   :  { %v295_v28 = vmax.f32 %v293_v26, %v294_v27 }
  0xf9   :  { %v296_v29 = vsub.f32 %v288_v20, %v295_v28 }
  0xfb   :  { %v297_v30 = vmul.f32 1.442695, %v296_v29 }
  0xfd   :  { %793 = vpow2.f32 %v297_v30  ;;  %v758_v30 = vld [vmem:[%s1099_s1 + $0x48] sm:$0xff] }
 0x10a   :  { %v794_v31 = vpop.eup %793 }
 0x10b   :  { %v299_v32 = vsel %vm63_vm2, %v794_v31, 0.0 }
 0x10c   :  { %v300_v34 = vrot.slane %v299_v32, 4 }
 0x10e   :  { %v301_v35 = vadd.f32 %v300_v34, %v299_v32 }
 0x110   :  { %v302_v36 = vrot.slane %v301_v35, 2 }
 0x112   :  { %v303_v38 = vadd.f32 %v302_v36, %v301_v35 }
 0x114   :  { %v304_v37 = vrot.slane %v303_v38, 1 }
 0x116   :  { %v305_v39 = vadd.f32 %v304_v37, %v303_v38 }
 0x118   :  { %795 = vlog2.f32 %v305_v39 }
 0x125   :  { %v796_v40 = vpop.eup %795 }
 0x126   :  { %v307_v41 = vmul.f32 0.6931472, %v796_v40 }
 0x128   :  { %v308_v42 = vadd.f32 %v307_v41, %v295_v28  ;;  %v410_v41 = vsel %vm408_vm10, 1, %v845_v6 }
 0x12a   :  { %v310_v44 = vadd.f32 %v756_v43, %v308_v42  ;;  %v984_v43 = vld [vmem:[%s1099_s1 + $0x50] sm:$0xff] }
 0x12c   :  { %v312_v46 = vrot.slane %v310_v44, 4  ;;  %v414_v44 = vrot.slane %v410_v41, %v881_v9 }
 0x12e   :  { %v314_v47 = vmax.f32 %v309_v45, %v312_v46  ;;  %v315_v48 = vmin.f32 %v309_v45, %v312_v46  ;;  %vm988_vm11 = vcmp.eq.s32.totalorder %v414_v44, 1 }
 0x130   :  { %v316_v49 = vsub.f32 %v315_v48, %v314_v47 }
 0x132   :  { %v317_v50 = vmul.f32 1.442695, %v316_v49 }
 0x134   :  { %797 = vpow2.f32 %v317_v50 }
 0x141   :  { %v798_v51 = vpop.eup %797 }
 0x142   :  { %v319_v52 = vadd.f32 1.0, %v798_v51 }
 0x144   :  { %799 = vlog2.f32 %v319_v52 }
 0x151   :  { %v800_v54 = vpop.eup %799 }
 0x152   :  { %v321_v57 = vmul.f32 0.6931472, %v800_v54 }
 0x154   :  { %v322_v58 = vadd.f32 %v321_v57, %v314_v47  ;;  %v436_v47 = vrot.slane %v984_v43, 4 }
 0x156   :  { %v323_v61 = vadd.f32 %v939_v10, %v322_v58 }
 0x158   :  { %v363_v62 = vadd.f32 %v361_v59, %v323_v61  ;;  %v341_v63 = vsel %vm966_vm9, %v323_v61, %v950_v2  ;;  %v384_v32 = vadd.f32 %v758_v30, %v323_v61 }
 0x15a   :  { %v364_v0 = vsel %vm63_vm2, %v363_v62, -inf }
 0x15b   :  { %v365_v4 = vrot.slane %v364_v0, 4 }
 0x15d   :  { %v366_v5 = vmax.f32 %v364_v0, %v365_v4 }
 0x15f   :  { %v367_v7 = vrot.slane %v366_v5, 2 }
 0x161   :  { %v368_v8 = vmax.f32 %v366_v5, %v367_v7 }
 0x163   :  { %v369_v13 = vrot.slane %v368_v8, 1 }
 0x165   :  { %v370_v14 = vmax.f32 %v368_v8, %v369_v13 }
 0x167   :  { %v371_v16 = vsub.f32 %v363_v62, %v370_v14 }
 0x169   :  { %v372_v17 = vmul.f32 1.442695, %v371_v16 }
 0x16b   :  { %801 = vpow2.f32 %v372_v17 }
 0x178   :  { %v802_v19 = vpop.eup %801 }
 0x179   :  { %v374_v20 = vsel %vm63_vm2, %v802_v19, 0.0 }
 0x17a   :  { %v375_v15 = vrot.slane %v374_v20, 4 }
 0x17c   :  { %v376_v22 = vadd.f32 %v375_v15, %v374_v20  ;;  %v760_v20 = vld [vmem:[%s1099_s1 + $0x58] sm:$0xff] }
 0x17e   :  { %v377_v23 = vrot.slane %v376_v22, 2 }
 0x180   :  { %v378_v25 = vadd.f32 %v377_v23, %v376_v22 }
 0x182   :  { %v379_v26 = vrot.slane %v378_v25, 1 }
 0x184   :  { %v380_v2 = vadd.f32 %v379_v26, %v378_v25 }
 0x186   :  { %803 = vlog2.f32 %v380_v2 }
 0x193   :  { %v804_v27 = vpop.eup %803 }
 0x194   :  { %v382_v28 = vmul.f32 0.6931472, %v804_v27 }
 0x196   :  { %v383_v29 = vadd.f32 %v382_v28, %v370_v14 }
 0x198   :  { %v385_v31 = vadd.f32 %v758_v30, %v383_v29  ;;  %v485_v30 = vsel %vm483_vm12, 1, %v845_v6 }
 0x19a   :  { %v387_v34 = vrot.slane %v385_v31, 4 }
 0x19c   :  { %v389_v35 = vmax.f32 %v384_v32, %v387_v34  ;;  %v390_v36 = vmin.f32 %v384_v32, %v387_v34  ;;  %v1007_v32 = vld [vmem:[%s1099_s1 + $0x60] sm:$0xff]  ;;  %v489_v34 = vrot.slane %v485_v30, %v881_v9 }
 0x19e   :  { %v391_v38 = vsub.f32 %v390_v36, %v389_v35  ;;  %vm1011_vm13 = vcmp.eq.s32.totalorder %v489_v34, 1 }
 0x1a0   :  { %v392_v37 = vmul.f32 1.442695, %v391_v38  ;;  %v511_v38 = vrot.slane %v1007_v32, 4 }
 0x1a2   :  { %805 = vpow2.f32 %v392_v37 }
 0x1af   :  { %v806_v39 = vpop.eup %805 }
 0x1b0   :  { %v394_v40 = vadd.f32 1.0, %v806_v39 }
 0x1b2   :  { %807 = vlog2.f32 %v394_v40 }
 0x1bf   :  { %v808_v42 = vpop.eup %807 }
 0x1c0   :  { %v396_v45 = vmul.f32 0.6931472, %v808_v42 }
 0x1c2   :  { %v397_v46 = vadd.f32 %v396_v45, %v389_v35 }
 0x1c4   :  { %v398_v49 = vadd.f32 %v962_v55, %v397_v46 }
 0x1c6   :  { %v438_v50 = vadd.f32 %v436_v47, %v398_v49  ;;  %v995_v51 = vsel %vm988_vm11, %v398_v49, %v341_v63  ;;  %v459_v22 = vadd.f32 %v760_v20, %v398_v49 }
 0x1c8   :  { %v439_v52 = vsel %vm63_vm2, %v438_v50, -inf }
 0x1c9   :  { %v440_v53 = vrot.slane %v439_v52, 4 }
 0x1cb   :  { %v441_v54 = vmax.f32 %v439_v52, %v440_v53 }
 0x1cd   :  { %v442_v56 = vrot.slane %v441_v54, 2 }
 0x1cf   :  { %v443_v57 = vmax.f32 %v441_v54, %v442_v56 }
 0x1d1   :  { %v444_v58 = vrot.slane %v443_v57, 1 }
 0x1d3   :  { %v445_v59 = vmax.f32 %v443_v57, %v444_v58 }
 0x1d5   :  { %v446_v61 = vsub.f32 %v438_v50, %v445_v59 }
 0x1d7   :  { %v447_v62 = vmul.f32 1.442695, %v446_v61 }
 0x1d9   :  { %809 = vpow2.f32 %v447_v62 }
 0x1e6   :  { %v810_v0 = vpop.eup %809 }
 0x1e7   :  { %v449_v4 = vsel %vm63_vm2, %v810_v0, 0.0 }
 0x1e8   :  { %v450_v5 = vrot.slane %v449_v4, 4 }
 0x1ea   :  { %v451_v7 = vadd.f32 %v450_v5, %v449_v4 }
 0x1ec   :  { %v452_v8 = vrot.slane %v451_v7, 2 }
 0x1ee   :  { %v453_v13 = vadd.f32 %v452_v8, %v451_v7  ;;  %v762_v7 = vld [vmem:[%s1099_s1 + $0x68] sm:$0xff] }
 0x1f0   :  { %v454_v63 = vrot.slane %v453_v13, 1 }
 0x1f2   :  { %v455_v14 = vadd.f32 %v454_v63, %v453_v13 }
 0x1f4   :  { %811 = vlog2.f32 %v455_v14 }
 0x201   :  { %v812_v16 = vpop.eup %811 }
 0x202   :  { %v457_v17 = vmul.f32 0.6931472, %v812_v16 }
 0x204   :  { %v458_v19 = vadd.f32 %v457_v17, %v445_v59 }
 0x206   :  { %v460_v15 = vadd.f32 %v760_v20, %v458_v19 }
 0x208   :  { %v462_v23 = vrot.slane %v460_v15, 4 }
 0x20a   :  { %v464_v25 = vmax.f32 %v459_v22, %v462_v23  ;;  %v465_v26 = vmin.f32 %v459_v22, %v462_v23  ;;  %v846_v22 = vmov -inf   ;;  %v560_v23 = vsel %vm558_vm14, 1, %v845_v6 }
 0x20b   :  { %32 = vst [vmem:[#allocation4] sm:$0xf] %v846_v22 }
 0x20c   :  { %v466_v2 = vsub.f32 %v465_v26, %v464_v25  ;;  %v1029_v26 = vld [vmem:[%s1099_s1 + $0x70] sm:$0xff] }
 0x20e   :  { %v467_v27 = vmul.f32 1.442695, %v466_v2  ;;  %v564_v2 = vrot.slane %v560_v23, %v881_v9 }
 0x210   :  { %813 = vpow2.f32 %v467_v27  ;;  %vm1033_vm15 = vcmp.eq.s32.totalorder %v564_v2, 1 }
 0x21d   :  { %v814_v28 = vpop.eup %813 }
 0x21e   :  { %v469_v29 = vadd.f32 1.0, %v814_v28 }
 0x220   :  { %815 = vlog2.f32 %v469_v29  ;;  %v586_v29 = vrot.slane %v1029_v26, 4 }
 0x22d   :  { %v816_v31 = vpop.eup %815 }
 0x22e   :  { %v471_v35 = vmul.f32 0.6931472, %v816_v31 }
 0x230   :  { %v472_v36 = vadd.f32 %v471_v35, %v464_v25 }
 0x232   :  { %v473_v39 = vadd.f32 %v984_v43, %v472_v36 }
 0x234   :  { %v513_v40 = vadd.f32 %v511_v38, %v473_v39  ;;  %v491_v41 = vsel %vm1011_vm13, %v473_v39, %v995_v51  ;;  %v534_v13 = vadd.f32 %v762_v7, %v473_v39 }
 0x236   :  { %v514_v42 = vsel %vm63_vm2, %v513_v40, -inf }
 0x237   :  { %v515_v44 = vrot.slane %v514_v42, 4 }
 0x239   :  { %v516_v45 = vmax.f32 %v514_v42, %v515_v44 }
 0x23b   :  { %v517_v46 = vrot.slane %v516_v45, 2 }
 0x23d   :  { %v518_v47 = vmax.f32 %v516_v45, %v517_v46 }
 0x23f   :  { %v519_v49 = vrot.slane %v518_v47, 1 }
 0x241   :  { %v520_v50 = vmax.f32 %v518_v47, %v519_v49 }
 0x243   :  { %v521_v52 = vsub.f32 %v513_v40, %v520_v50 }
 0x245   :  { %v522_v53 = vmul.f32 1.442695, %v521_v52 }
 0x247   :  { %817 = vpow2.f32 %v522_v53 }
 0x254   :  { %v818_v54 = vpop.eup %817 }
 0x255   :  { %v524_v56 = vsel %vm63_vm2, %v818_v54, 0.0 }
 0x256   :  { %v525_v57 = vrot.slane %v524_v56, 4 }
 0x258   :  { %v526_v58 = vadd.f32 %v525_v57, %v524_v56 }
 0x25a   :  { %v527_v59 = vrot.slane %v526_v58, 2 }
 0x25c   :  { %v528_v61 = vadd.f32 %v527_v59, %v526_v58 }
 0x25e   :  { %v529_v62 = vrot.slane %v528_v61, 1 }
 0x260   :  { %v530_v51 = vadd.f32 %v529_v62, %v528_v61  ;;  %v764_v62 = vld [vmem:[%s1099_s1 + $0x78] sm:$0xff] }
 0x262   :  { %819 = vlog2.f32 %v530_v51 }
 0x26f   :  { %v820_v0 = vpop.eup %819 }
 0x270   :  { %v532_v4 = vmul.f32 0.6931472, %v820_v0 }
 0x272   :  { %v533_v5 = vadd.f32 %v532_v4, %v520_v50 }
 0x274   :  { %v535_v8 = vadd.f32 %v762_v7, %v533_v5 }
 0x276   :  { %v537_v63 = vrot.slane %v535_v8, 4 }
 0x278   :  { %v539_v14 = vmax.f32 %v534_v13, %v537_v63  ;;  %v540_v16 = vmin.f32 %v534_v13, %v537_v63  ;;  %v36_v63 = vld [vmem:[#allocation4] sm:$0xf] }
 0x27a   :  { %v541_v17 = vsub.f32 %v540_v16, %v539_v14  ;;  %v635_v16 = vsel %vm633_vm0, 1, %v845_v6 }
 0x27b   :  { %v639_v3 = vrot.slane %v635_v16, %v881_v9  ;;  %v765_v9 = vld [vmem:[%s1099_s1 + $0x80] sm:$0xff] }
 0x27c   :  { %v542_v19 = vmul.f32 1.442695, %v541_v17 }
 0x27e   :  { %821 = vpow2.f32 %v542_v19 }
 0x28b   :  { %v822_v20 = vpop.eup %821 }
 0x28c   :  { %v544_v15 = vadd.f32 1.0, %v822_v20 }
 0x28e   :  { %823 = vlog2.f32 %v544_v15 }
 0x29b   :  { %v824_v25 = vpop.eup %823 }
 0x29c   :  { %v546_v27 = vmul.f32 0.6931472, %v824_v25 }
 0x29e   :  { %v547_v28 = vadd.f32 %v546_v27, %v539_v14  ;;  %v56_v14 = vrot.slane %v36_v63, 4 }
 0x2a0   :  { %v548_v31 = vadd.f32 %v1007_v32, %v547_v28  ;;  %v58_v17 = vsel %vm54_vm4, %v865_v1, %v56_v14 }
 0x2a1   :  { %v134_v19 = vsel %vm889_vm1, %v887_v11, %v58_v17  ;;  %vm1071_vm1 = vcmp.eq.s32.totalorder %v639_v3, 1 }
 0x2a2   :  { %v588_v34 = vadd.f32 %v586_v29, %v548_v31  ;;  %v1040_v35 = vsel %vm1033_vm15, %v548_v31, %v491_v41  ;;  %v609_v0 = vadd.f32 %v764_v62, %v548_v31  ;;  %v209_v15 = vsel %vm921_vm5, %v910_v21, %v134_v19 }
 0x2a3   :  { %v284_v6 = vsel %vm943_vm7, %v939_v10, %v209_v15 }
 0x2a4   :  { %v589_v36 = vsel %vm63_vm2, %v588_v34, -inf  ;;  %v359_v1 = vsel %vm966_vm9, %v962_v55, %v284_v6 }
 0x2a5   :  { %v590_v38 = vrot.slane %v589_v36, 4  ;;  %v434_v11 = vsel %vm988_vm11, %v984_v43, %v359_v1  ;;  %v661_v43 = vrot.slane %v765_v9, 4 }
 0x2a6   :  { %v509_v12 = vsel %vm1011_vm13, %v1007_v32, %v434_v11 }
 0x2a7   :  { %v591_v39 = vmax.f32 %v589_v36, %v590_v38  ;;  %v584_v33 = vsel %vm1033_vm15, %v1029_v26, %v509_v12 }
 0x2a8   :  { %v659_v10 = vsel %vm1071_vm1, %v765_v9, %v584_v33 }
 0x2a9   :  { %v592_v40 = vrot.slane %v591_v39, 2  ;;  %719 = vst [vmem:[#allocation4 - $0x4] sm:$0xf0] %v659_v10 }
 0x2ab   :  { %v593_v42 = vmax.f32 %v591_v39, %v592_v40 }
 0x2ad   :  { %v594_v44 = vrot.slane %v593_v42, 1 }
 0x2af   :  { %v595_v45 = vmax.f32 %v593_v42, %v594_v44 }
 0x2b1   :  { %v596_v46 = vsub.f32 %v588_v34, %v595_v45 }
 0x2b3   :  { %v597_v47 = vmul.f32 1.442695, %v596_v46 }
 0x2b5   :  { %825 = vpow2.f32 %v597_v47 }
 0x2c2   :  { %v826_v49 = vpop.eup %825 }
 0x2c3   :  { %v599_v50 = vsel %vm63_vm2, %v826_v49, 0.0  ;;  %v766_v49 = vld [vmem:[%s1099_s1 + $0x88] sm:$0xff] }
 0x2c4   :  { %v600_v52 = vrot.slane %v599_v50, 4 }
 0x2c6   :  { %v601_v53 = vadd.f32 %v600_v52, %v599_v50 }
 0x2c8   :  { %v602_v54 = vrot.slane %v601_v53, 2 }
 0x2ca   :  { %v603_v56 = vadd.f32 %v602_v54, %v601_v53 }
 0x2cc   :  { %v604_v41 = vrot.slane %v603_v56, 1 }
 0x2ce   :  { %v605_v57 = vadd.f32 %v604_v41, %v603_v56 }
 0x2d0   :  { %827 = vlog2.f32 %v605_v57 }
 0x2dd   :  { %v828_v58 = vpop.eup %827 }
 0x2de   :  { %v607_v59 = vmul.f32 0.6931472, %v828_v58 }
 0x2e0   :  { %v608_v61 = vadd.f32 %v607_v59, %v595_v45 }
 0x2e2   :  { %v610_v51 = vadd.f32 %v764_v62, %v608_v61 }
 0x2e4   :  { %v612_v4 = vrot.slane %v610_v51, 4 }
 0x2e6   :  { %v614_v5 = vmax.f32 %v609_v0, %v612_v4  ;;  %v615_v7 = vmin.f32 %v609_v0, %v612_v4 }
 0x2e8   :  { %v616_v8 = vsub.f32 %v615_v7, %v614_v5 }
 0x2ea   :  { %v617_v13 = vmul.f32 1.442695, %v616_v8 }
 0x2ec   :  { %829 = vpow2.f32 %v617_v13 }
 0x2f9   :  { %v830_v20 = vpop.eup %829 }
 0x2fa   :  { %v619_v22 = vadd.f32 1.0, %v830_v20 }
 0x2fc   :  { %831 = vlog2.f32 %v619_v22 }
 0x309   :  { %v832_v18 = vpop.eup %831 }
 0x30a   :  { %v621_v55 = vmul.f32 0.6931472, %v832_v18 }
 0x30c   :  { %v622_v60 = vadd.f32 %v621_v55, %v614_v5  ;;  %v724_v5 = vld [vmem:[#allocation4] sm:$0xf] }
 0x30e   :  { %v623_v48 = vadd.f32 %v1029_v26, %v622_v60 }
 0x310   :  { %717 = vst [vmem:[#allocation2] sm:$0xf] %v623_v48  ;;  %v641_v32 = vsel %vm1071_vm1, %v623_v48, %v1040_v35  ;;  %v663_v37 = vadd.f32 %v661_v43, %v623_v48  ;;  %v684_v52 = vadd.f32 %v766_v49, %v623_v48 }
 0x312   :  { %v664_v23 = vsel %vm63_vm2, %v663_v37, -inf }
 0x313   :  { %v665_v25 = vrot.slane %v664_v23, 4 }
 0x315   :  { %v666_v2 = vmax.f32 %v664_v23, %v665_v25 }
 0x317   :  { %v667_v27 = vrot.slane %v666_v2, 2 }
 0x319   :  { %v668_v28 = vmax.f32 %v666_v2, %v667_v27 }
 0x31b   :  { %v669_v29 = vrot.slane %v668_v28, 1 }
 0x31d   :  { %v670_v30 = vmax.f32 %v668_v28, %v669_v29 }
 0x31f   :  { %v671_v31 = vsub.f32 %v663_v37, %v670_v30 }
 0x321   :  { %v672_v34 = vmul.f32 1.442695, %v671_v31 }
 0x323   :  { %833 = vpow2.f32 %v672_v34 }
 0x330   :  { %v834_v36 = vpop.eup %833 }
 0x331   :  { %v674_v26 = vsel %vm63_vm2, %v834_v36, 0.0 }
 0x332   :  { %v675_v38 = vrot.slane %v674_v26, 4 }
 0x334   :  { %v676_v39 = vadd.f32 %v675_v38, %v674_v26 }
 0x336   :  { %v677_v40 = vrot.slane %v676_v39, 2 }
 0x338   :  { %v678_v42 = vadd.f32 %v677_v40, %v676_v39 }
 0x33a   :  { %v679_v35 = vrot.slane %v678_v42, 1 }
 0x33c   :  { %v680_v44 = vadd.f32 %v679_v35, %v678_v42 }
 0x33e   :  { %835 = vlog2.f32 %v680_v44 }
 0x34b   :  { %v836_v45 = vpop.eup %835 }
 0x34c   :  { %v682_v46 = vmul.f32 0.6931472, %v836_v45 }
 0x34e   :  { %v683_v47 = vadd.f32 %v682_v46, %v670_v30 }
 0x350   :  { %v685_v50 = vadd.f32 %v766_v49, %v683_v47 }
 0x352   :  { %v687_v53 = vrot.slane %v685_v50, 4 }
 0x354   :  { %v689_v54 = vmax.f32 %v684_v52, %v687_v53  ;;  %v690_v56 = vmin.f32 %v684_v52, %v687_v53 }
 0x356   :  { %v691_v41 = vsub.f32 %v690_v56, %v689_v54 }
 0x358   :  { %v692_v57 = vmul.f32 1.442695, %v691_v41 }
 0x35a   :  { %837 = vpow2.f32 %v692_v57 }
 0x367   :  { %v838_v58 = vpop.eup %837 }
 0x368   :  { %v694_v59 = vadd.f32 1.0, %v838_v58 }
 0x36a   :  { %839 = vlog2.f32 %v694_v59 }
 0x377   :  { %v840_v61 = vpop.eup %839 }
 0x378   :  { %v696_v62 = vmul.f32 0.6931472, %v840_v61 }
 0x37a   :  { %v697_v51 = vadd.f32 %v696_v62, %v689_v54 }
 0x37c   :  { %v698_v0 = vadd.f32 %v765_v9, %v697_v51 }
 0x37e   :  { %v716_v4 = vsel %vm54_vm4, %v698_v0, %v641_v32 }
 0x37f   :  { %718 = vst [vmem:[#allocation3] sm:$0xf] %v716_v4 }
 0x386   :  { %v723_v7 = vld [vmem:[#allocation3] sm:$0xf] }
 0x387   :  { %v725_v8 = vadd.f32 %v724_v5, %v723_v7 }
 0x389   :  { %v726_v13 = vsel %vm63_vm2, %v725_v8, -inf }
 0x38a   :  { %v727_v63 = vrot.slane %v726_v13, 4 }
 0x38c   :  { %v728_v14 = vmax.f32 %v726_v13, %v727_v63 }
 0x38e   :  { %v729_v16 = vrot.slane %v728_v14, 2 }
 0x390   :  { %v730_v17 = vmax.f32 %v728_v14, %v729_v16 }
 0x392   :  { %v731_v19 = vrot.slane %v730_v17, 1 }
 0x394   :  { %v732_v20 = vmax.f32 %v730_v17, %v731_v19 }
 0x396   :  { %v733_v15 = vsub.f32 %v725_v8, %v732_v20 }
 0x398   :  { %v734_v22 = vmul.f32 1.442695, %v733_v15 }
 0x39a   :  { %841 = vpow2.f32 %v734_v22 }
 0x3a7   :  { %v842_v3 = vpop.eup %841 }
 0x3a8   :  { %v736_v6 = vsel %vm63_vm2, %v842_v3, 0.0 }
 0x3a9   :  { %v737_v24 = vrot.slane %v736_v6, 4 }
 0x3ab   :  { %v738_v1 = vadd.f32 %v737_v24, %v736_v6 }
 0x3ad   :  { %v739_v11 = vrot.slane %v738_v1, 2 }
 0x3af   :  { %v740_v12 = vadd.f32 %v739_v11, %v738_v1 }
 0x3b1   :  { %v741_v21 = vrot.slane %v740_v12, 1 }
 0x3b3   :  { %v742_v9 = vadd.f32 %v741_v21, %v740_v12 }
 0x3b5   :  { %843 = vlog2.f32 %v742_v9 }
 0x3c2   :  { %v844_v33 = vpop.eup %843 }
 0x3c3   :  { %v744_v10 = vmul.f32 0.6931472, %v844_v33 }
 0x3c5   :  { %v745_v18 = vadd.f32 %v744_v10, %v732_v20 }
 0x3c7   :  { %746 = vst [vmem:[%s1101_s2] sm:$0x1] %v745_v18 }

</bundles_post_ra>
